<compile_context>
chip_gen: v7x
topology: tpu7x:2x2x1
jax: 0.10.0
libtpu: 0.0.40
codegen_flags: <defaults>
</compile_context>

<pallas_src>
import functools

import jax
import jax.numpy as jnp
from jax.experimental import pallas as pl
from jax.experimental.pallas import tpu as pltpu


# ----------------------------------------------------------------------------
# Fused kernel
# ----------------------------------------------------------------------------
def _vae_fused_kernel(
    x_ref,        # (T*Bp, Din)  bf16  time-major, batch-padded, flattened input
    enc_w_ref,    # (H+Din, 4H)  bf16  [enc_whh_t ; enc_wih_t]
    dec_w_ref,    # (H+L, 4H)    bf16  [dec_whh_t ; dec_wih_t]
    head_w_ref,   # (H, 2L+Dout) f32   [wmu_t | wlv_t | wout_t]
    bias_ref,     # (1, 8H+2L+Dout) f32  [enc_b | dec_b | bmu | blv | bout]
    eps_ref,      # (Bp, L)      f32   reparameterization noise
    dec_ref,      # (Bp, T*Dout) f32   OUT: lane-dense decoded slab
    mulv_ref,     # (Bp, 2L)     f32   OUT: [mu | logvar]
    *, seq_len, batch_p, input_dim, hidden_dim, latent_dim, out_dim,
):
    T, Bp, Din, H, L, Dout = seq_len, batch_p, input_dim, hidden_dim, latent_dim, out_dim
    f32 = jnp.float32
    bf16 = jnp.bfloat16

    # ---- static slices of the packed operands (free views) ----
    e_whh = enc_w_ref[0:H, :]                 # (H, 4H)   bf16
    e_wih = enc_w_ref[H:H + Din, :]           # (Din, 4H) bf16
    d_whh = dec_w_ref[0:H, :]                 # (H, 4H)   bf16
    d_wih = dec_w_ref[H:H + L, :]             # (L, 4H)   bf16
    w_mulv = head_w_ref[:, 0:2 * L]           # (H, 2L)   f32
    w_out = head_w_ref[:, 2 * L:2 * L + Dout]  # (H, Dout) f32
    enc_b = bias_ref[:, 0:4 * H]              # (1, 4H)
    dec_b = bias_ref[:, 4 * H:8 * H]          # (1, 4H)
    mulv_b = bias_ref[:, 8 * H:8 * H + 2 * L]             # (1, 2L)
    out_b = bias_ref[:, 8 * H + 2 * L:8 * H + 2 * L + Dout]  # (1, Dout)

    def cell(gates, c):
        # Activate the full 4H = 128-lane gate vector once (one EUP pass per
        # nonlinearity), then slice out the PyTorch-ordered gates (i, f, g, o).
        sg = jax.nn.sigmoid(gates)
        tg = jnp.tanh(gates)
        i = sg[:, 0 * H:1 * H]
        f = sg[:, 1 * H:2 * H]
        g = tg[:, 2 * H:3 * H]
        o = sg[:, 3 * H:4 * H]
        c_new = f * c + i * g
        h_new = o * jnp.tanh(c_new)
        return h_new, c_new

    # ---------------- encoder LSTM ----------------
    # Hoisted input projection: one bf16 matmul covering all T time steps.
    # TODO(synk): for large T*Bp, stream x from HBM / compute gates_in per
    # chunk instead of materializing (T*Bp, 4H) (v7x has only 64 MiB VMEM).
    gates_in = (
        jnp.dot(x_ref[...], e_wih, preferred_element_type=f32) + enc_b
    )                                                     # (T*Bp, 4H) f32
    h = jnp.zeros((Bp, H), f32)
    c = jnp.zeros((Bp, H), f32)
    for t in range(T):                                    # fully unrolled
        g_t = gates_in[t * Bp:(t + 1) * Bp, :] + jnp.dot(
            h.astype(bf16), e_whh, preferred_element_type=f32)
        h, c = cell(g_t, c)

    # ---------------- VAE head (merged mu | logvar) ----------------
    h_last = jnp.maximum(h, 0.0)                          # ReLU(h)[:, -1, :]
    mulv = jnp.dot(h_last, w_mulv, preferred_element_type=f32) + mulv_b
    mulv_ref[...] = mulv                                  # (Bp, 2L)
    mu = mulv[:, 0:L]
    lv = mulv[:, L:2 * L]
    z = mu + eps_ref[...] * jnp.exp(0.5 * lv)             # reparameterize

    # ---------------- decoder LSTM ----------------
    # Decoder input is z at every step -> input projection computed once.
    dec_gin = (
        jnp.dot(z.astype(bf16), d_wih, preferred_element_type=f32) + dec_b
    )                                                     # (Bp, 4H) f32
    h = jnp.zeros((Bp, H), f32)
    c = jnp.zeros((Bp, H), f32)
    hs = []
    for t in range(T):                                    # fully unrolled
        g_t = dec_gin + jnp.dot(h.astype(bf16), d_whh, preferred_element_type=f32)
        h, c = cell(g_t, c)
        hs.append(h)

    # Output projections deferred until after the recurrence (keeps the MRF
    # clear for the critical h@Whh chain), then ONE lane-dense (8,128) store.
    outs = [jnp.dot(ht, w_out, preferred_element_type=f32) + out_b for ht in hs]
    dec_ref[...] = jnp.concatenate(outs, axis=1)          # (Bp, T*Dout)


# ----------------------------------------------------------------------------
# Wrapper
# ----------------------------------------------------------------------------
_VMEM = pl.BlockSpec(memory_space=pltpu.MemorySpace.VMEM)


def vae_forward(x, params, eps):
    """x: (B, T, input_dim) f32; eps: (B, latent_dim) ~ N(0,1) f32."""
    B, T, Din = x.shape
    H = params["enc_whh_t"].shape[0]
    L = params["wmu_t"].shape[1]
    Dout = params["wout_t"].shape[1]
    Bp = max(8, -(-B // 8) * 8)          # pad batch to a sublane multiple

    # Layout plumbing stays in the XLA wrapper: time-major, pad batch, flatten,
    # cast MXU operands to bf16.
    x_t = jnp.transpose(x.astype(jnp.float32), (1, 0, 2))      # (T, B, Din)
    x_t = jnp.pad(x_t, ((0, 0), (0, Bp - B), (0, 0)))
    x_flat = x_t.reshape(T * Bp, Din).astype(jnp.bfloat16)      # (T*Bp, Din)
    eps_p = jnp.pad(eps.astype(jnp.float32), ((0, Bp - B), (0, 0)))

    # Pack the small operands -> 6 DMA descriptors instead of 14.
    enc_w = jnp.concatenate(
        [params["enc_whh_t"], params["enc_wih_t"]], axis=0).astype(jnp.bfloat16)
    dec_w = jnp.concatenate(
        [params["dec_whh_t"], params["dec_wih_t"]], axis=0).astype(jnp.bfloat16)
    head_w = jnp.concatenate(
        [params["wmu_t"], params["wlv_t"], params["wout_t"]], axis=1)       # f32
    bias = jnp.concatenate(
        [params["enc_b"], params["dec_b"],
         params["bmu"], params["blv"], params["bout"]], axis=1)             # f32

    kernel = functools.partial(
        _vae_fused_kernel, seq_len=T, batch_p=Bp,
        input_dim=Din, hidden_dim=H, latent_dim=L, out_dim=Dout)

    out_shapes = (
        jax.ShapeDtypeStruct((Bp, T * Dout), jnp.float32),   # decoded slab
        jax.ShapeDtypeStruct((Bp, 2 * L), jnp.float32),      # [mu | logvar]
    )
    dec_slab, mulv = pl.pallas_call(
        kernel,
        out_shape=out_shapes,
        in_specs=[_VMEM] * 6,
        out_specs=(_VMEM, _VMEM),
        # TODO(synk): for large batch add a leading "parallel" grid axis over
        # batch blocks (uses both v7x TensorCores); at B=2 stay gridless to
        # avoid per-step grid overhead.
    )(x_flat, enc_w, dec_w, head_w, bias, eps_p)

    # (Bp, T*Dout) -> (B, T, Dout); lanes are t-major so this is a pure reshape.
    decoded = dec_slab[:B].reshape(B, T, Dout)
    mu = mulv[:B, :L]
    logvar = mulv[:B, L:]
    return decoded, mu, logvar


# ----------------------------------------------------------------------------
# Parameter init (deterministic, synthetic; mirrors nn.LSTM / xavier Linear)
# ----------------------------------------------------------------------------
def xavier_uniform(key, shape):
    fan_out, fan_in = shape
    limit = jnp.sqrt(6.0 / (fan_in + fan_out))
    return jax.random.uniform(key, shape, jnp.float32, -limit, limit)


def init_params(key, input_dim, hidden_dim, latent_dim, output_dim):
    ks = jax.random.split(key, 8)
    s = 1.0 / jnp.sqrt(hidden_dim)

    def u(k, shape):
        return jax.random.uniform(k, shape, jnp.float32, -s, s)

    params = {
        # encoder LSTM (PyTorch layout (4H, D) -> stored transposed (D, 4H))
        "enc_wih_t": u(ks[0], (4 * hidden_dim, input_dim)).T,
        "enc_whh_t": u(ks[1], (4 * hidden_dim, hidden_dim)).T,
        "enc_b": (u(ks[2], (4 * hidden_dim,)) + u(ks[3], (4 * hidden_dim,))).reshape(1, -1),
        # decoder LSTM
        "dec_wih_t": u(ks[4], (4 * hidden_dim, latent_dim)).T,
        "dec_whh_t": u(ks[5], (4 * hidden_dim, hidden_dim)).T,
        "dec_b": (u(ks[6], (4 * hidden_dim,)) + u(ks[7], (4 * hidden_dim,))).reshape(1, -1),
        # linear heads: xavier_uniform weights, zero bias (initialize_weights)
        "wmu_t": xavier_uniform(jax.random.fold_in(key, 10), (latent_dim, hidden_dim)).T,
        "bmu": jnp.zeros((1, latent_dim), jnp.float32),
        "wlv_t": xavier_uniform(jax.random.fold_in(key, 11), (latent_dim, hidden_dim)).T,
        "blv": jnp.zeros((1, latent_dim), jnp.float32),
        "wout_t": xavier_uniform(jax.random.fold_in(key, 12), (output_dim, hidden_dim)).T,
        "bout": jnp.zeros((1, output_dim), jnp.float32),
    }
    return params


if __name__ == "__main__":
    # Small shapes consistent with the module: batch=2, seq=8,
    # input_dim=16, hidden_dim=32 (4H = 128 lanes), latent_dim=8, output_dim=16.
    B, T = 2, 8
    input_dim, hidden_dim, latent_dim, output_dim = 16, 32, 8, 16

    key = jax.random.PRNGKey(0)
    kx, keps, kparams = jax.random.split(key, 3)

    x = jax.random.normal(kx, (B, T, input_dim), jnp.float32)
    eps = jax.random.normal(keps, (B, latent_dim), jnp.float32)  # randn_like(std)
    params = init_params(kparams, input_dim, hidden_dim, latent_dim, output_dim)

    fwd = jax.jit(vae_forward)
    decoded, mu, logvar = fwd(x, params, eps)
    jax.block_until_ready((decoded, mu, logvar))

    assert decoded.shape == (B, T, output_dim)
    assert mu.shape == (B, latent_dim)
    assert logvar.shape == (B, latent_dim)
    assert bool(jnp.all(jnp.isfinite(decoded)))
    assert bool(jnp.all(jnp.isfinite(mu)))
    assert bool(jnp.all(jnp.isfinite(logvar)))
    print("KERNEL_OK")
</pallas_src>

<mosaic_0001>
module attributes {stable_mosaic.version = 11 : i64} {
  func.func @_vae_fused_kernel(%arg0: memref<64x16xbf16, #tpu.memory_space<vmem>>, %arg1: memref<48x128xbf16, #tpu.memory_space<vmem>>, %arg2: memref<40x128xbf16, #tpu.memory_space<vmem>>, %arg3: memref<32x32xf32, #tpu.memory_space<vmem>>, %arg4: memref<1x288xf32, #tpu.memory_space<vmem>>, %arg5: memref<8x8xf32, #tpu.memory_space<vmem>>, %arg6: memref<8x128xf32, #tpu.memory_space<vmem>>, %arg7: memref<8x16xf32, #tpu.memory_space<vmem>>) attributes {dimension_semantics = [], scalar_prefetch = 0 : i64, scratch_operands = 0 : i64, tpu.core_type = #tpu.core_type<tc>} {
    %c0 = arith.constant 0 : index
    %c0_0 = arith.constant 0 : index
    %0 = vector.load %arg1[%c0, %c0_0] : memref<48x128xbf16, #tpu.memory_space<vmem>>, vector<32x128xbf16>
    %c32 = arith.constant 32 : index
    %c0_1 = arith.constant 0 : index
    %1 = vector.load %arg1[%c32, %c0_1] : memref<48x128xbf16, #tpu.memory_space<vmem>>, vector<16x128xbf16>
    %c0_2 = arith.constant 0 : index
    %c0_3 = arith.constant 0 : index
    %2 = vector.load %arg2[%c0_2, %c0_3] : memref<40x128xbf16, #tpu.memory_space<vmem>>, vector<32x128xbf16>
    %c32_4 = arith.constant 32 : index
    %c0_5 = arith.constant 0 : index
    %3 = vector.load %arg2[%c32_4, %c0_5] : memref<40x128xbf16, #tpu.memory_space<vmem>>, vector<8x128xbf16>
    %c0_6 = arith.constant 0 : index
    %c0_7 = arith.constant 0 : index
    %4 = vector.load %arg3[%c0_6, %c0_7] : memref<32x32xf32, #tpu.memory_space<vmem>>, vector<32x16xf32>
    %c0_8 = arith.constant 0 : index
    %c16 = arith.constant 16 : index
    %5 = vector.load %arg3[%c0_8, %c16] : memref<32x32xf32, #tpu.memory_space<vmem>>, vector<32x16xf32>
    %c0_9 = arith.constant 0 : index
    %c0_10 = arith.constant 0 : index
    %6 = vector.load %arg4[%c0_9, %c0_10] : memref<1x288xf32, #tpu.memory_space<vmem>>, vector<1x128xf32>
    %c0_11 = arith.constant 0 : index
    %c128 = arith.constant 128 : index
    %7 = vector.load %arg4[%c0_11, %c128] : memref<1x288xf32, #tpu.memory_space<vmem>>, vector<1x128xf32>
    %c0_12 = arith.constant 0 : index
    %c256 = arith.constant 256 : index
    %8 = vector.load %arg4[%c0_12, %c256] : memref<1x288xf32, #tpu.memory_space<vmem>>, vector<1x16xf32>
    %c0_13 = arith.constant 0 : index
    %c272 = arith.constant 272 : index
    %9 = vector.load %arg4[%c0_13, %c272] : memref<1x288xf32, #tpu.memory_space<vmem>>, vector<1x16xf32>
    %c0_14 = arith.constant 0 : index
    %c0_15 = arith.constant 0 : index
    %10 = vector.load %arg0[%c0_14, %c0_15] : memref<64x16xbf16, #tpu.memory_space<vmem>>, vector<64x16xbf16>
    %cst = arith.constant dense<0.000000e+00> : vector<64x128xf32>
    %11 = tpu.matmul %10, %1, %cst {dimension_numbers = #tpu.dot_dimension_numbers<[1], [0], [0], [1], [0, 0, 1, 1], [], []>} : vector<64x16xbf16>, vector<16x128xbf16>, vector<64x128xf32> -> vector<64x128xf32>
    %12 = vector.broadcast %6 : vector<1x128xf32> to vector<64x128xf32>
    %13 = arith.addf %11, %12 : vector<64x128xf32>
    %cst_16 = arith.constant 0.000000e+00 : f32
    %14 = vector.broadcast %cst_16 : f32 to vector<8x32xf32>
    %cst_17 = arith.constant 0.000000e+00 : f32
    %15 = vector.broadcast %cst_17 : f32 to vector<8x32xf32>
    %16 = vector.extract_strided_slice %13 {offsets = [0, 0], sizes = [8, 128], strides = [1, 1]} : vector<64x128xf32> to vector<8x128xf32>
    %17 = arith.truncf %14 : vector<8x32xf32> to vector<8x32xbf16>
    %cst_18 = arith.constant dense<0.000000e+00> : vector<8x128xf32>
    %18 = tpu.matmul %17, %0, %cst_18 {dimension_numbers = #tpu.dot_dimension_numbers<[1], [0], [0], [1], [0, 0, 1, 1], [], []>} : vector<8x32xbf16>, vector<32x128xbf16>, vector<8x128xf32> -> vector<8x128xf32>
    %19 = arith.addf %16, %18 : vector<8x128xf32>
    %20 = arith.negf %19 : vector<8x128xf32>
    %21 = math.exp %20 : vector<8x128xf32>
    %cst_19 = arith.constant 1.000000e+00 : f32
    %22 = vector.broadcast %cst_19 : f32 to vector<8x128xf32>
    %23 = arith.addf %22, %21 : vector<8x128xf32>
    %24 = arith.divf %22, %23 : vector<8x128xf32>
    %25 = math.tanh %19 : vector<8x128xf32>
    %26 = vector.extract_strided_slice %24 {offsets = [0, 0], sizes = [8, 32], strides = [1, 1]} : vector<8x128xf32> to vector<8x32xf32>
    %27 = vector.extract_strided_slice %24 {offsets = [0, 32], sizes = [8, 32], strides = [1, 1]} : vector<8x128xf32> to vector<8x32xf32>
    %28 = vector.extract_strided_slice %25 {offsets = [0, 64], sizes = [8, 32], strides = [1, 1]} : vector<8x128xf32> to vector<8x32xf32>
    %29 = vector.extract_strided_slice %24 {offsets = [0, 96], sizes = [8, 32], strides = [1, 1]} : vector<8x128xf32> to vector<8x32xf32>
    %30 = arith.mulf %27, %15 : vector<8x32xf32>
    %31 = arith.mulf %26, %28 : vector<8x32xf32>
    %32 = arith.addf %30, %31 : vector<8x32xf32>
    %33 = math.tanh %32 : vector<8x32xf32>
    %34 = arith.mulf %29, %33 : vector<8x32xf32>
    %35 = vector.extract_strided_slice %13 {offsets = [8, 0], sizes = [8, 128], strides = [1, 1]} : vector<64x128xf32> to vector<8x128xf32>
    %36 = arith.truncf %34 : vector<8x32xf32> to vector<8x32xbf16>
    %cst_20 = arith.constant dense<0.000000e+00> : vector<8x128xf32>
    %37 = tpu.matmul %36, %0, %cst_20 {dimension_numbers = #tpu.dot_dimension_numbers<[1], [0], [0], [1], [0, 0, 1, 1], [], []>} : vector<8x32xbf16>, vector<32x128xbf16>, vector<8x128xf32> -> vector<8x128xf32>
    %38 = arith.addf %35, %37 : vector<8x128xf32>
    %39 = arith.negf %38 : vector<8x128xf32>
    %40 = math.exp %39 : vector<8x128xf32>
    %cst_21 = arith.constant 1.000000e+00 : f32
    %41 = vector.broadcast %cst_21 : f32 to vector<8x128xf32>
    %42 = arith.addf %41, %40 : vector<8x128xf32>
    %43 = arith.divf %41, %42 : vector<8x128xf32>
    %44 = math.tanh %38 : vector<8x128xf32>
    %45 = vector.extract_strided_slice %43 {offsets = [0, 0], sizes = [8, 32], strides = [1, 1]} : vector<8x128xf32> to vector<8x32xf32>
    %46 = vector.extract_strided_slice %43 {offsets = [0, 32], sizes = [8, 32], strides = [1, 1]} : vector<8x128xf32> to vector<8x32xf32>
    %47 = vector.extract_strided_slice %44 {offsets = [0, 64], sizes = [8, 32], strides = [1, 1]} : vector<8x128xf32> to vector<8x32xf32>
    %48 = vector.extract_strided_slice %43 {offsets = [0, 96], sizes = [8, 32], strides = [1, 1]} : vector<8x128xf32> to vector<8x32xf32>
    %49 = arith.mulf %46, %32 : vector<8x32xf32>
    %50 = arith.mulf %45, %47 : vector<8x32xf32>
    %51 = arith.addf %49, %50 : vector<8x32xf32>
    %52 = math.tanh %51 : vector<8x32xf32>
    %53 = arith.mulf %48, %52 : vector<8x32xf32>
    %54 = vector.extract_strided_slice %13 {offsets = [16, 0], sizes = [8, 128], strides = [1, 1]} : vector<64x128xf32> to vector<8x128xf32>
    %55 = arith.truncf %53 : vector<8x32xf32> to vector<8x32xbf16>
    %cst_22 = arith.constant dense<0.000000e+00> : vector<8x128xf32>
    %56 = tpu.matmul %55, %0, %cst_22 {dimension_numbers = #tpu.dot_dimension_numbers<[1], [0], [0], [1], [0, 0, 1, 1], [], []>} : vector<8x32xbf16>, vector<32x128xbf16>, vector<8x128xf32> -> vector<8x128xf32>
    %57 = arith.addf %54, %56 : vector<8x128xf32>
    %58 = arith.negf %57 : vector<8x128xf32>
    %59 = math.exp %58 : vector<8x128xf32>
    %cst_23 = arith.constant 1.000000e+00 : f32
    %60 = vector.broadcast %cst_23 : f32 to vector<8x128xf32>
    %61 = arith.addf %60, %59 : vector<8x128xf32>
    %62 = arith.divf %60, %61 : vector<8x128xf32>
    %63 = math.tanh %57 : vector<8x128xf32>
    %64 = vector.extract_strided_slice %62 {offsets = [0, 0], sizes = [8, 32], strides = [1, 1]} : vector<8x128xf32> to vector<8x32xf32>
    %65 = vector.extract_strided_slice %62 {offsets = [0, 32], sizes = [8, 32], strides = [1, 1]} : vector<8x128xf32> to vector<8x32xf32>
    %66 = vector.extract_strided_slice %63 {offsets = [0, 64], sizes = [8, 32], strides = [1, 1]} : vector<8x128xf32> to vector<8x32xf32>
    %67 = vector.extract_strided_slice %62 {offsets = [0, 96], sizes = [8, 32], strides = [1, 1]} : vector<8x128xf32> to vector<8x32xf32>
    %68 = arith.mulf %65, %51 : vector<8x32xf32>
    %69 = arith.mulf %64, %66 : vector<8x32xf32>
    %70 = arith.addf %68, %69 : vector<8x32xf32>
    %71 = math.tanh %70 : vector<8x32xf32>
    %72 = arith.mulf %67, %71 : vector<8x32xf32>
    %73 = vector.extract_strided_slice %13 {offsets = [24, 0], sizes = [8, 128], strides = [1, 1]} : vector<64x128xf32> to vector<8x128xf32>
    %74 = arith.truncf %72 : vector<8x32xf32> to vector<8x32xbf16>
    %cst_24 = arith.constant dense<0.000000e+00> : vector<8x128xf32>
    %75 = tpu.matmul %74, %0, %cst_24 {dimension_numbers = #tpu.dot_dimension_numbers<[1], [0], [0], [1], [0, 0, 1, 1], [], []>} : vector<8x32xbf16>, vector<32x128xbf16>, vector<8x128xf32> -> vector<8x128xf32>
    %76 = arith.addf %73, %75 : vector<8x128xf32>
    %77 = arith.negf %76 : vector<8x128xf32>
    %78 = math.exp %77 : vector<8x128xf32>
    %cst_25 = arith.constant 1.000000e+00 : f32
    %79 = vector.broadcast %cst_25 : f32 to vector<8x128xf32>
    %80 = arith.addf %79, %78 : vector<8x128xf32>
    %81 = arith.divf %79, %80 : vector<8x128xf32>
    %82 = math.tanh %76 : vector<8x128xf32>
    %83 = vector.extract_strided_slice %81 {offsets = [0, 0], sizes = [8, 32], strides = [1, 1]} : vector<8x128xf32> to vector<8x32xf32>
    %84 = vector.extract_strided_slice %81 {offsets = [0, 32], sizes = [8, 32], strides = [1, 1]} : vector<8x128xf32> to vector<8x32xf32>
    %85 = vector.extract_strided_slice %82 {offsets = [0, 64], sizes = [8, 32], strides = [1, 1]} : vector<8x128xf32> to vector<8x32xf32>
    %86 = vector.extract_strided_slice %81 {offsets = [0, 96], sizes = [8, 32], strides = [1, 1]} : vector<8x128xf32> to vector<8x32xf32>
    %87 = arith.mulf %84, %70 : vector<8x32xf32>
    %88 = arith.mulf %83, %85 : vector<8x32xf32>
    %89 = arith.addf %87, %88 : vector<8x32xf32>
    %90 = math.tanh %89 : vector<8x32xf32>
    %91 = arith.mulf %86, %90 : vector<8x32xf32>
    %92 = vector.extract_strided_slice %13 {offsets = [32, 0], sizes = [8, 128], strides = [1, 1]} : vector<64x128xf32> to vector<8x128xf32>
    %93 = arith.truncf %91 : vector<8x32xf32> to vector<8x32xbf16>
    %cst_26 = arith.constant dense<0.000000e+00> : vector<8x128xf32>
    %94 = tpu.matmul %93, %0, %cst_26 {dimension_numbers = #tpu.dot_dimension_numbers<[1], [0], [0], [1], [0, 0, 1, 1], [], []>} : vector<8x32xbf16>, vector<32x128xbf16>, vector<8x128xf32> -> vector<8x128xf32>
    %95 = arith.addf %92, %94 : vector<8x128xf32>
    %96 = arith.negf %95 : vector<8x128xf32>
    %97 = math.exp %96 : vector<8x128xf32>
    %cst_27 = arith.constant 1.000000e+00 : f32
    %98 = vector.broadcast %cst_27 : f32 to vector<8x128xf32>
    %99 = arith.addf %98, %97 : vector<8x128xf32>
    %100 = arith.divf %98, %99 : vector<8x128xf32>
    %101 = math.tanh %95 : vector<8x128xf32>
    %102 = vector.extract_strided_slice %100 {offsets = [0, 0], sizes = [8, 32], strides = [1, 1]} : vector<8x128xf32> to vector<8x32xf32>
    %103 = vector.extract_strided_slice %100 {offsets = [0, 32], sizes = [8, 32], strides = [1, 1]} : vector<8x128xf32> to vector<8x32xf32>
    %104 = vector.extract_strided_slice %101 {offsets = [0, 64], sizes = [8, 32], strides = [1, 1]} : vector<8x128xf32> to vector<8x32xf32>
    %105 = vector.extract_strided_slice %100 {offsets = [0, 96], sizes = [8, 32], strides = [1, 1]} : vector<8x128xf32> to vector<8x32xf32>
    %106 = arith.mulf %103, %89 : vector<8x32xf32>
    %107 = arith.mulf %102, %104 : vector<8x32xf32>
    %108 = arith.addf %106, %107 : vector<8x32xf32>
    %109 = math.tanh %108 : vector<8x32xf32>
    %110 = arith.mulf %105, %109 : vector<8x32xf32>
    %111 = vector.extract_strided_slice %13 {offsets = [40, 0], sizes = [8, 128], strides = [1, 1]} : vector<64x128xf32> to vector<8x128xf32>
    %112 = arith.truncf %110 : vector<8x32xf32> to vector<8x32xbf16>
    %cst_28 = arith.constant dense<0.000000e+00> : vector<8x128xf32>
    %113 = tpu.matmul %112, %0, %cst_28 {dimension_numbers = #tpu.dot_dimension_numbers<[1], [0], [0], [1], [0, 0, 1, 1], [], []>} : vector<8x32xbf16>, vector<32x128xbf16>, vector<8x128xf32> -> vector<8x128xf32>
    %114 = arith.addf %111, %113 : vector<8x128xf32>
    %115 = arith.negf %114 : vector<8x128xf32>
    %116 = math.exp %115 : vector<8x128xf32>
    %cst_29 = arith.constant 1.000000e+00 : f32
    %117 = vector.broadcast %cst_29 : f32 to vector<8x128xf32>
    %118 = arith.addf %117, %116 : vector<8x128xf32>
    %119 = arith.divf %117, %118 : vector<8x128xf32>
    %120 = math.tanh %114 : vector<8x128xf32>
    %121 = vector.extract_strided_slice %119 {offsets = [0, 0], sizes = [8, 32], strides = [1, 1]} : vector<8x128xf32> to vector<8x32xf32>
    %122 = vector.extract_strided_slice %119 {offsets = [0, 32], sizes = [8, 32], strides = [1, 1]} : vector<8x128xf32> to vector<8x32xf32>
    %123 = vector.extract_strided_slice %120 {offsets = [0, 64], sizes = [8, 32], strides = [1, 1]} : vector<8x128xf32> to vector<8x32xf32>
    %124 = vector.extract_strided_slice %119 {offsets = [0, 96], sizes = [8, 32], strides = [1, 1]} : vector<8x128xf32> to vector<8x32xf32>
    %125 = arith.mulf %122, %108 : vector<8x32xf32>
    %126 = arith.mulf %121, %123 : vector<8x32xf32>
    %127 = arith.addf %125, %126 : vector<8x32xf32>
    %128 = math.tanh %127 : vector<8x32xf32>
    %129 = arith.mulf %124, %128 : vector<8x32xf32>
    %130 = vector.extract_strided_slice %13 {offsets = [48, 0], sizes = [8, 128], strides = [1, 1]} : vector<64x128xf32> to vector<8x128xf32>
    %131 = arith.truncf %129 : vector<8x32xf32> to vector<8x32xbf16>
    %cst_30 = arith.constant dense<0.000000e+00> : vector<8x128xf32>
    %132 = tpu.matmul %131, %0, %cst_30 {dimension_numbers = #tpu.dot_dimension_numbers<[1], [0], [0], [1], [0, 0, 1, 1], [], []>} : vector<8x32xbf16>, vector<32x128xbf16>, vector<8x128xf32> -> vector<8x128xf32>
    %133 = arith.addf %130, %132 : vector<8x128xf32>
    %134 = arith.negf %133 : vector<8x128xf32>
    %135 = math.exp %134 : vector<8x128xf32>
    %cst_31 = arith.constant 1.000000e+00 : f32
    %136 = vector.broadcast %cst_31 : f32 to vector<8x128xf32>
    %137 = arith.addf %136, %135 : vector<8x128xf32>
    %138 = arith.divf %136, %137 : vector<8x128xf32>
    %139 = math.tanh %133 : vector<8x128xf32>
    %140 = vector.extract_strided_slice %138 {offsets = [0, 0], sizes = [8, 32], strides = [1, 1]} : vector<8x128xf32> to vector<8x32xf32>
    %141 = vector.extract_strided_slice %138 {offsets = [0, 32], sizes = [8, 32], strides = [1, 1]} : vector<8x128xf32> to vector<8x32xf32>
    %142 = vector.extract_strided_slice %139 {offsets = [0, 64], sizes = [8, 32], strides = [1, 1]} : vector<8x128xf32> to vector<8x32xf32>
    %143 = vector.extract_strided_slice %138 {offsets = [0, 96], sizes = [8, 32], strides = [1, 1]} : vector<8x128xf32> to vector<8x32xf32>
    %144 = arith.mulf %141, %127 : vector<8x32xf32>
    %145 = arith.mulf %140, %142 : vector<8x32xf32>
    %146 = arith.addf %144, %145 : vector<8x32xf32>
    %147 = math.tanh %146 : vector<8x32xf32>
    %148 = arith.mulf %143, %147 : vector<8x32xf32>
    %149 = vector.extract_strided_slice %13 {offsets = [56, 0], sizes = [8, 128], strides = [1, 1]} : vector<64x128xf32> to vector<8x128xf32>
    %150 = arith.truncf %148 : vector<8x32xf32> to vector<8x32xbf16>
    %cst_32 = arith.constant dense<0.000000e+00> : vector<8x128xf32>
    %151 = tpu.matmul %150, %0, %cst_32 {dimension_numbers = #tpu.dot_dimension_numbers<[1], [0], [0], [1], [0, 0, 1, 1], [], []>} : vector<8x32xbf16>, vector<32x128xbf16>, vector<8x128xf32> -> vector<8x128xf32>
    %152 = arith.addf %149, %151 : vector<8x128xf32>
    %153 = arith.negf %152 : vector<8x128xf32>
    %154 = math.exp %153 : vector<8x128xf32>
    %cst_33 = arith.constant 1.000000e+00 : f32
    %155 = vector.broadcast %cst_33 : f32 to vector<8x128xf32>
    %156 = arith.addf %155, %154 : vector<8x128xf32>
    %157 = arith.divf %155, %156 : vector<8x128xf32>
    %158 = math.tanh %152 : vector<8x128xf32>
    %159 = vector.extract_strided_slice %157 {offsets = [0, 0], sizes = [8, 32], strides = [1, 1]} : vector<8x128xf32> to vector<8x32xf32>
    %160 = vector.extract_strided_slice %157 {offsets = [0, 32], sizes = [8, 32], strides = [1, 1]} : vector<8x128xf32> to vector<8x32xf32>
    %161 = vector.extract_strided_slice %158 {offsets = [0, 64], sizes = [8, 32], strides = [1, 1]} : vector<8x128xf32> to vector<8x32xf32>
    %162 = vector.extract_strided_slice %157 {offsets = [0, 96], sizes = [8, 32], strides = [1, 1]} : vector<8x128xf32> to vector<8x32xf32>
    %163 = arith.mulf %160, %146 : vector<8x32xf32>
    %164 = arith.mulf %159, %161 : vector<8x32xf32>
    %165 = arith.addf %163, %164 : vector<8x32xf32>
    %166 = math.tanh %165 : vector<8x32xf32>
    %167 = arith.mulf %162, %166 : vector<8x32xf32>
    %cst_34 = arith.constant 0.000000e+00 : f32
    %168 = vector.broadcast %cst_34 : f32 to vector<8x32xf32>
    %169 = arith.maximumf %167, %168 : vector<8x32xf32>
    %cst_35 = arith.constant dense<0.000000e+00> : vector<8x16xf32>
    %170 = tpu.matmul %169, %4, %cst_35 {dimension_numbers = #tpu.dot_dimension_numbers<[1], [0], [0], [1], [0, 0, 1, 1], [], []>} : vector<8x32xf32>, vector<32x16xf32>, vector<8x16xf32> -> vector<8x16xf32>
    %171 = vector.broadcast %8 : vector<1x16xf32> to vector<8x16xf32>
    %172 = arith.addf %170, %171 : vector<8x16xf32>
    %c0_36 = arith.constant 0 : index
    %c0_37 = arith.constant 0 : index
    %173 = vector.load %arg7[%c0_36, %c0_37] : memref<8x16xf32, #tpu.memory_space<vmem>>, vector<8x16xf32>
    tpu.vector_store %arg7[%c0_36, %c0_37], %172 {strides = array<i32>} : memref<8x16xf32, #tpu.memory_space<vmem>>, vector<8x16xf32>,
    %174 = vector.extract_strided_slice %172 {offsets = [0, 0], sizes = [8, 8], strides = [1, 1]} : vector<8x16xf32> to vector<8x8xf32>
    %175 = vector.extract_strided_slice %172 {offsets = [0, 8], sizes = [8, 8], strides = [1, 1]} : vector<8x16xf32> to vector<8x8xf32>
    %c0_38 = arith.constant 0 : index
    %c0_39 = arith.constant 0 : index
    %176 = vector.load %arg5[%c0_38, %c0_39] : memref<8x8xf32, #tpu.memory_space<vmem>>, vector<8x8xf32>
    %cst_40 = arith.constant 5.000000e-01 : f32
    %177 = vector.broadcast %cst_40 : f32 to vector<8x8xf32>
    %178 = arith.mulf %177, %175 : vector<8x8xf32>
    %179 = math.exp %178 : vector<8x8xf32>
    %180 = arith.mulf %176, %179 : vector<8x8xf32>
    %181 = arith.addf %174, %180 : vector<8x8xf32>
    %182 = arith.truncf %181 : vector<8x8xf32> to vector<8x8xbf16>
    %cst_41 = arith.constant dense<0.000000e+00> : vector<8x128xf32>
    %183 = tpu.matmul %182, %3, %cst_41 {dimension_numbers = #tpu.dot_dimension_numbers<[1], [0], [0], [1], [0, 0, 1, 1], [], []>} : vector<8x8xbf16>, vector<8x128xbf16>, vector<8x128xf32> -> vector<8x128xf32>
    %184 = vector.broadcast %7 : vector<1x128xf32> to vector<8x128xf32>
    %185 = arith.addf %183, %184 : vector<8x128xf32>
    %cst_42 = arith.constant 0.000000e+00 : f32
    %186 = vector.broadcast %cst_42 : f32 to vector<8x32xf32>
    %cst_43 = arith.constant 0.000000e+00 : f32
    %187 = vector.broadcast %cst_43 : f32 to vector<8x32xf32>
    %188 = arith.truncf %186 : vector<8x32xf32> to vector<8x32xbf16>
    %cst_44 = arith.constant dense<0.000000e+00> : vector<8x128xf32>
    %189 = tpu.matmul %188, %2, %cst_44 {dimension_numbers = #tpu.dot_dimension_numbers<[1], [0], [0], [1], [0, 0, 1, 1], [], []>} : vector<8x32xbf16>, vector<32x128xbf16>, vector<8x128xf32> -> vector<8x128xf32>
    %190 = arith.addf %185, %189 : vector<8x128xf32>
    %191 = arith.negf %190 : vector<8x128xf32>
    %192 = math.exp %191 : vector<8x128xf32>
    %cst_45 = arith.constant 1.000000e+00 : f32
    %193 = vector.broadcast %cst_45 : f32 to vector<8x128xf32>
    %194 = arith.addf %193, %192 : vector<8x128xf32>
    %195 = arith.divf %193, %194 : vector<8x128xf32>
    %196 = math.tanh %190 : vector<8x128xf32>
    %197 = vector.extract_strided_slice %195 {offsets = [0, 0], sizes = [8, 32], strides = [1, 1]} : vector<8x128xf32> to vector<8x32xf32>
    %198 = vector.extract_strided_slice %195 {offsets = [0, 32], sizes = [8, 32], strides = [1, 1]} : vector<8x128xf32> to vector<8x32xf32>
    %199 = vector.extract_strided_slice %196 {offsets = [0, 64], sizes = [8, 32], strides = [1, 1]} : vector<8x128xf32> to vector<8x32xf32>
    %200 = vector.extract_strided_slice %195 {offsets = [0, 96], sizes = [8, 32], strides = [1, 1]} : vector<8x128xf32> to vector<8x32xf32>
    %201 = arith.mulf %198, %187 : vector<8x32xf32>
    %202 = arith.mulf %197, %199 : vector<8x32xf32>
    %203 = arith.addf %201, %202 : vector<8x32xf32>
    %204 = math.tanh %203 : vector<8x32xf32>
    %205 = arith.mulf %200, %204 : vector<8x32xf32>
    %206 = arith.truncf %205 : vector<8x32xf32> to vector<8x32xbf16>
    %cst_46 = arith.constant dense<0.000000e+00> : vector<8x128xf32>
    %207 = tpu.matmul %206, %2, %cst_46 {dimension_numbers = #tpu.dot_dimension_numbers<[1], [0], [0], [1], [0, 0, 1, 1], [], []>} : vector<8x32xbf16>, vector<32x128xbf16>, vector<8x128xf32> -> vector<8x128xf32>
    %208 = arith.addf %185, %207 : vector<8x128xf32>
    %209 = arith.negf %208 : vector<8x128xf32>
    %210 = math.exp %209 : vector<8x128xf32>
    %cst_47 = arith.constant 1.000000e+00 : f32
    %211 = vector.broadcast %cst_47 : f32 to vector<8x128xf32>
    %212 = arith.addf %211, %210 : vector<8x128xf32>
    %213 = arith.divf %211, %212 : vector<8x128xf32>
    %214 = math.tanh %208 : vector<8x128xf32>
    %215 = vector.extract_strided_slice %213 {offsets = [0, 0], sizes = [8, 32], strides = [1, 1]} : vector<8x128xf32> to vector<8x32xf32>
    %216 = vector.extract_strided_slice %213 {offsets = [0, 32], sizes = [8, 32], strides = [1, 1]} : vector<8x128xf32> to vector<8x32xf32>
    %217 = vector.extract_strided_slice %214 {offsets = [0, 64], sizes = [8, 32], strides = [1, 1]} : vector<8x128xf32> to vector<8x32xf32>
    %218 = vector.extract_strided_slice %213 {offsets = [0, 96], sizes = [8, 32], strides = [1, 1]} : vector<8x128xf32> to vector<8x32xf32>
    %219 = arith.mulf %216, %203 : vector<8x32xf32>
    %220 = arith.mulf %215, %217 : vector<8x32xf32>
    %221 = arith.addf %219, %220 : vector<8x32xf32>
    %222 = math.tanh %221 : vector<8x32xf32>
    %223 = arith.mulf %218, %222 : vector<8x32xf32>
    %224 = arith.truncf %223 : vector<8x32xf32> to vector<8x32xbf16>
    %cst_48 = arith.constant dense<0.000000e+00> : vector<8x128xf32>
    %225 = tpu.matmul %224, %2, %cst_48 {dimension_numbers = #tpu.dot_dimension_numbers<[1], [0], [0], [1], [0, 0, 1, 1], [], []>} : vector<8x32xbf16>, vector<32x128xbf16>, vector<8x128xf32> -> vector<8x128xf32>
    %226 = arith.addf %185, %225 : vector<8x128xf32>
    %227 = arith.negf %226 : vector<8x128xf32>
    %228 = math.exp %227 : vector<8x128xf32>
    %cst_49 = arith.constant 1.000000e+00 : f32
    %229 = vector.broadcast %cst_49 : f32 to vector<8x128xf32>
    %230 = arith.addf %229, %228 : vector<8x128xf32>
    %231 = arith.divf %229, %230 : vector<8x128xf32>
    %232 = math.tanh %226 : vector<8x128xf32>
    %233 = vector.extract_strided_slice %231 {offsets = [0, 0], sizes = [8, 32], strides = [1, 1]} : vector<8x128xf32> to vector<8x32xf32>
    %234 = vector.extract_strided_slice %231 {offsets = [0, 32], sizes = [8, 32], strides = [1, 1]} : vector<8x128xf32> to vector<8x32xf32>
    %235 = vector.extract_strided_slice %232 {offsets = [0, 64], sizes = [8, 32], strides = [1, 1]} : vector<8x128xf32> to vector<8x32xf32>
    %236 = vector.extract_strided_slice %231 {offsets = [0, 96], sizes = [8, 32], strides = [1, 1]} : vector<8x128xf32> to vector<8x32xf32>
    %237 = arith.mulf %234, %221 : vector<8x32xf32>
    %238 = arith.mulf %233, %235 : vector<8x32xf32>
    %239 = arith.addf %237, %238 : vector<8x32xf32>
    %240 = math.tanh %239 : vector<8x32xf32>
    %241 = arith.mulf %236, %240 : vector<8x32xf32>
    %242 = arith.truncf %241 : vector<8x32xf32> to vector<8x32xbf16>
    %cst_50 = arith.constant dense<0.000000e+00> : vector<8x128xf32>
    %243 = tpu.matmul %242, %2, %cst_50 {dimension_numbers = #tpu.dot_dimension_numbers<[1], [0], [0], [1], [0, 0, 1, 1], [], []>} : vector<8x32xbf16>, vector<32x128xbf16>, vector<8x128xf32> -> vector<8x128xf32>
    %244 = arith.addf %185, %243 : vector<8x128xf32>
    %245 = arith.negf %244 : vector<8x128xf32>
    %246 = math.exp %245 : vector<8x128xf32>
    %cst_51 = arith.constant 1.000000e+00 : f32
    %247 = vector.broadcast %cst_51 : f32 to vector<8x128xf32>
    %248 = arith.addf %247, %246 : vector<8x128xf32>
    %249 = arith.divf %247, %248 : vector<8x128xf32>
    %250 = math.tanh %244 : vector<8x128xf32>
    %251 = vector.extract_strided_slice %249 {offsets = [0, 0], sizes = [8, 32], strides = [1, 1]} : vector<8x128xf32> to vector<8x32xf32>
    %252 = vector.extract_strided_slice %249 {offsets = [0, 32], sizes = [8, 32], strides = [1, 1]} : vector<8x128xf32> to vector<8x32xf32>
    %253 = vector.extract_strided_slice %250 {offsets = [0, 64], sizes = [8, 32], strides = [1, 1]} : vector<8x128xf32> to vector<8x32xf32>
    %254 = vector.extract_strided_slice %249 {offsets = [0, 96], sizes = [8, 32], strides = [1, 1]} : vector<8x128xf32> to vector<8x32xf32>
    %255 = arith.mulf %252, %239 : vector<8x32xf32>
    %256 = arith.mulf %251, %253 : vector<8x32xf32>
    %257 = arith.addf %255, %256 : vector<8x32xf32>
    %258 = math.tanh %257 : vector<8x32xf32>
    %259 = arith.mulf %254, %258 : vector<8x32xf32>
    %260 = arith.truncf %259 : vector<8x32xf32> to vector<8x32xbf16>
    %cst_52 = arith.constant dense<0.000000e+00> : vector<8x128xf32>
    %261 = tpu.matmul %260, %2, %cst_52 {dimension_numbers = #tpu.dot_dimension_numbers<[1], [0], [0], [1], [0, 0, 1, 1], [], []>} : vector<8x32xbf16>, vector<32x128xbf16>, vector<8x128xf32> -> vector<8x128xf32>
    %262 = arith.addf %185, %261 : vector<8x128xf32>
    %263 = arith.negf %262 : vector<8x128xf32>
    %264 = math.exp %263 : vector<8x128xf32>
    %cst_53 = arith.constant 1.000000e+00 : f32
    %265 = vector.broadcast %cst_53 : f32 to vector<8x128xf32>
    %266 = arith.addf %265, %264 : vector<8x128xf32>
    %267 = arith.divf %265, %266 : vector<8x128xf32>
    %268 = math.tanh %262 : vector<8x128xf32>
    %269 = vector.extract_strided_slice %267 {offsets = [0, 0], sizes = [8, 32], strides = [1, 1]} : vector<8x128xf32> to vector<8x32xf32>
    %270 = vector.extract_strided_slice %267 {offsets = [0, 32], sizes = [8, 32], strides = [1, 1]} : vector<8x128xf32> to vector<8x32xf32>
    %271 = vector.extract_strided_slice %268 {offsets = [0, 64], sizes = [8, 32], strides = [1, 1]} : vector<8x128xf32> to vector<8x32xf32>
    %272 = vector.extract_strided_slice %267 {offsets = [0, 96], sizes = [8, 32], strides = [1, 1]} : vector<8x128xf32> to vector<8x32xf32>
    %273 = arith.mulf %270, %257 : vector<8x32xf32>
    %274 = arith.mulf %269, %271 : vector<8x32xf32>
    %275 = arith.addf %273, %274 : vector<8x32xf32>
    %276 = math.tanh %275 : vector<8x32xf32>
    %277 = arith.mulf %272, %276 : vector<8x32xf32>
    %278 = arith.truncf %277 : vector<8x32xf32> to vector<8x32xbf16>
    %cst_54 = arith.constant dense<0.000000e+00> : vector<8x128xf32>
    %279 = tpu.matmul %278, %2, %cst_54 {dimension_numbers = #tpu.dot_dimension_numbers<[1], [0], [0], [1], [0, 0, 1, 1], [], []>} : vector<8x32xbf16>, vector<32x128xbf16>, vector<8x128xf32> -> vector<8x128xf32>
    %280 = arith.addf %185, %279 : vector<8x128xf32>
    %281 = arith.negf %280 : vector<8x128xf32>
    %282 = math.exp %281 : vector<8x128xf32>
    %cst_55 = arith.constant 1.000000e+00 : f32
    %283 = vector.broadcast %cst_55 : f32 to vector<8x128xf32>
    %284 = arith.addf %283, %282 : vector<8x128xf32>
    %285 = arith.divf %283, %284 : vector<8x128xf32>
    %286 = math.tanh %280 : vector<8x128xf32>
    %287 = vector.extract_strided_slice %285 {offsets = [0, 0], sizes = [8, 32], strides = [1, 1]} : vector<8x128xf32> to vector<8x32xf32>
    %288 = vector.extract_strided_slice %285 {offsets = [0, 32], sizes = [8, 32], strides = [1, 1]} : vector<8x128xf32> to vector<8x32xf32>
    %289 = vector.extract_strided_slice %286 {offsets = [0, 64], sizes = [8, 32], strides = [1, 1]} : vector<8x128xf32> to vector<8x32xf32>
    %290 = vector.extract_strided_slice %285 {offsets = [0, 96], sizes = [8, 32], strides = [1, 1]} : vector<8x128xf32> to vector<8x32xf32>
    %291 = arith.mulf %288, %275 : vector<8x32xf32>
    %292 = arith.mulf %287, %289 : vector<8x32xf32>
    %293 = arith.addf %291, %292 : vector<8x32xf32>
    %294 = math.tanh %293 : vector<8x32xf32>
    %295 = arith.mulf %290, %294 : vector<8x32xf32>
    %296 = arith.truncf %295 : vector<8x32xf32> to vector<8x32xbf16>
    %cst_56 = arith.constant dense<0.000000e+00> : vector<8x128xf32>
    %297 = tpu.matmul %296, %2, %cst_56 {dimension_numbers = #tpu.dot_dimension_numbers<[1], [0], [0], [1], [0, 0, 1, 1], [], []>} : vector<8x32xbf16>, vector<32x128xbf16>, vector<8x128xf32> -> vector<8x128xf32>
    %298 = arith.addf %185, %297 : vector<8x128xf32>
    %299 = arith.negf %298 : vector<8x128xf32>
    %300 = math.exp %299 : vector<8x128xf32>
    %cst_57 = arith.constant 1.000000e+00 : f32
    %301 = vector.broadcast %cst_57 : f32 to vector<8x128xf32>
    %302 = arith.addf %301, %300 : vector<8x128xf32>
    %303 = arith.divf %301, %302 : vector<8x128xf32>
    %304 = math.tanh %298 : vector<8x128xf32>
    %305 = vector.extract_strided_slice %303 {offsets = [0, 0], sizes = [8, 32], strides = [1, 1]} : vector<8x128xf32> to vector<8x32xf32>
    %306 = vector.extract_strided_slice %303 {offsets = [0, 32], sizes = [8, 32], strides = [1, 1]} : vector<8x128xf32> to vector<8x32xf32>
    %307 = vector.extract_strided_slice %304 {offsets = [0, 64], sizes = [8, 32], strides = [1, 1]} : vector<8x128xf32> to vector<8x32xf32>
    %308 = vector.extract_strided_slice %303 {offsets = [0, 96], sizes = [8, 32], strides = [1, 1]} : vector<8x128xf32> to vector<8x32xf32>
    %309 = arith.mulf %306, %293 : vector<8x32xf32>
    %310 = arith.mulf %305, %307 : vector<8x32xf32>
    %311 = arith.addf %309, %310 : vector<8x32xf32>
    %312 = math.tanh %311 : vector<8x32xf32>
    %313 = arith.mulf %308, %312 : vector<8x32xf32>
    %314 = arith.truncf %313 : vector<8x32xf32> to vector<8x32xbf16>
    %cst_58 = arith.constant dense<0.000000e+00> : vector<8x128xf32>
    %315 = tpu.matmul %314, %2, %cst_58 {dimension_numbers = #tpu.dot_dimension_numbers<[1], [0], [0], [1], [0, 0, 1, 1], [], []>} : vector<8x32xbf16>, vector<32x128xbf16>, vector<8x128xf32> -> vector<8x128xf32>
    %316 = arith.addf %185, %315 : vector<8x128xf32>
    %317 = arith.negf %316 : vector<8x128xf32>
    %318 = math.exp %317 : vector<8x128xf32>
    %cst_59 = arith.constant 1.000000e+00 : f32
    %319 = vector.broadcast %cst_59 : f32 to vector<8x128xf32>
    %320 = arith.addf %319, %318 : vector<8x128xf32>
    %321 = arith.divf %319, %320 : vector<8x128xf32>
    %322 = math.tanh %316 : vector<8x128xf32>
    %323 = vector.extract_strided_slice %321 {offsets = [0, 0], sizes = [8, 32], strides = [1, 1]} : vector<8x128xf32> to vector<8x32xf32>
    %324 = vector.extract_strided_slice %321 {offsets = [0, 32], sizes = [8, 32], strides = [1, 1]} : vector<8x128xf32> to vector<8x32xf32>
    %325 = vector.extract_strided_slice %322 {offsets = [0, 64], sizes = [8, 32], strides = [1, 1]} : vector<8x128xf32> to vector<8x32xf32>
    %326 = vector.extract_strided_slice %321 {offsets = [0, 96], sizes = [8, 32], strides = [1, 1]} : vector<8x128xf32> to vector<8x32xf32>
    %327 = arith.mulf %324, %311 : vector<8x32xf32>
    %328 = arith.mulf %323, %325 : vector<8x32xf32>
    %329 = arith.addf %327, %328 : vector<8x32xf32>
    %330 = math.tanh %329 : vector<8x32xf32>
    %331 = arith.mulf %326, %330 : vector<8x32xf32>
    %cst_60 = arith.constant dense<0.000000e+00> : vector<8x16xf32>
    %332 = tpu.matmul %205, %5, %cst_60 {dimension_numbers = #tpu.dot_dimension_numbers<[1], [0], [0], [1], [0, 0, 1, 1], [], []>} : vector<8x32xf32>, vector<32x16xf32>, vector<8x16xf32> -> vector<8x16xf32>
    %333 = vector.broadcast %9 : vector<1x16xf32> to vector<8x16xf32>
    %334 = arith.addf %332, %333 : vector<8x16xf32>
    %cst_61 = arith.constant dense<0.000000e+00> : vector<8x16xf32>
    %335 = tpu.matmul %223, %5, %cst_61 {dimension_numbers = #tpu.dot_dimension_numbers<[1], [0], [0], [1], [0, 0, 1, 1], [], []>} : vector<8x32xf32>, vector<32x16xf32>, vector<8x16xf32> -> vector<8x16xf32>
    %336 = vector.broadcast %9 : vector<1x16xf32> to vector<8x16xf32>
    %337 = arith.addf %335, %336 : vector<8x16xf32>
    %cst_62 = arith.constant dense<0.000000e+00> : vector<8x16xf32>
    %338 = tpu.matmul %241, %5, %cst_62 {dimension_numbers = #tpu.dot_dimension_numbers<[1], [0], [0], [1], [0, 0, 1, 1], [], []>} : vector<8x32xf32>, vector<32x16xf32>, vector<8x16xf32> -> vector<8x16xf32>
    %339 = vector.broadcast %9 : vector<1x16xf32> to vector<8x16xf32>
    %340 = arith.addf %338, %339 : vector<8x16xf32>
    %cst_63 = arith.constant dense<0.000000e+00> : vector<8x16xf32>
    %341 = tpu.matmul %259, %5, %cst_63 {dimension_numbers = #tpu.dot_dimension_numbers<[1], [0], [0], [1], [0, 0, 1, 1], [], []>} : vector<8x32xf32>, vector<32x16xf32>, vector<8x16xf32> -> vector<8x16xf32>
    %342 = vector.broadcast %9 : vector<1x16xf32> to vector<8x16xf32>
    %343 = arith.addf %341, %342 : vector<8x16xf32>
    %cst_64 = arith.constant dense<0.000000e+00> : vector<8x16xf32>
    %344 = tpu.matmul %277, %5, %cst_64 {dimension_numbers = #tpu.dot_dimension_numbers<[1], [0], [0], [1], [0, 0, 1, 1], [], []>} : vector<8x32xf32>, vector<32x16xf32>, vector<8x16xf32> -> vector<8x16xf32>
    %345 = vector.broadcast %9 : vector<1x16xf32> to vector<8x16xf32>
    %346 = arith.addf %344, %345 : vector<8x16xf32>
    %cst_65 = arith.constant dense<0.000000e+00> : vector<8x16xf32>
    %347 = tpu.matmul %295, %5, %cst_65 {dimension_numbers = #tpu.dot_dimension_numbers<[1], [0], [0], [1], [0, 0, 1, 1], [], []>} : vector<8x32xf32>, vector<32x16xf32>, vector<8x16xf32> -> vector<8x16xf32>
    %348 = vector.broadcast %9 : vector<1x16xf32> to vector<8x16xf32>
    %349 = arith.addf %347, %348 : vector<8x16xf32>
    %cst_66 = arith.constant dense<0.000000e+00> : vector<8x16xf32>
    %350 = tpu.matmul %313, %5, %cst_66 {dimension_numbers = #tpu.dot_dimension_numbers<[1], [0], [0], [1], [0, 0, 1, 1], [], []>} : vector<8x32xf32>, vector<32x16xf32>, vector<8x16xf32> -> vector<8x16xf32>
    %351 = vector.broadcast %9 : vector<1x16xf32> to vector<8x16xf32>
    %352 = arith.addf %350, %351 : vector<8x16xf32>
    %cst_67 = arith.constant dense<0.000000e+00> : vector<8x16xf32>
    %353 = tpu.matmul %331, %5, %cst_67 {dimension_numbers = #tpu.dot_dimension_numbers<[1], [0], [0], [1], [0, 0, 1, 1], [], []>} : vector<8x32xf32>, vector<32x16xf32>, vector<8x16xf32> -> vector<8x16xf32>
    %354 = vector.broadcast %9 : vector<1x16xf32> to vector<8x16xf32>
    %355 = arith.addf %353, %354 : vector<8x16xf32>
    %356 = tpu.concatenate %334, %337, %340, %343, %346, %349, %352, %355 in 1 : vector<8x16xf32>, vector<8x16xf32>, vector<8x16xf32>, vector<8x16xf32>, vector<8x16xf32>, vector<8x16xf32>, vector<8x16xf32>, vector<8x16xf32> -> vector<8x128xf32>
    %c0_68 = arith.constant 0 : index
    %c0_69 = arith.constant 0 : index
    %357 = vector.load %arg6[%c0_68, %c0_69] : memref<8x128xf32, #tpu.memory_space<vmem>>, vector<8x128xf32>
    tpu.vector_store %arg6[%c0_68, %c0_69], %356 {strides = array<i32>} : memref<8x128xf32, #tpu.memory_space<vmem>>, vector<8x128xf32>,
    return
  }
}

</mosaic_0001>

<bundles_post_ra>
// kernel: vae_forward.1
= control target key start
LH: loop header
LB: loop body
LE: loop exit
PB: predicated region body
PF: predicated region fallthrough
CT: control target
= control target key end

     0   :  { %vm84_vm0 = vcmask 130048   ;;  %v2760_v5 = vmov 0.0   ;;  %vm2761_vm1 = vmmov 0   ;;  %v2762_v8 = vmov 0   ;;  %s2763_s15 = smov 64   ;;  %s2764_s16 = smov 32   ;;  %s3202_s1 = inlined_call_operand.vmem [shape: bf16[48,128], index: 1, kind: input, shape index: {}]   ;;  %s3203_s0 = inlined_call_operand.vmem [shape: bf16[64,16], index: 0, kind: input, shape index: {}]   ;;  %s3204_s4 = inlined_call_operand.vmem [shape: f32[1,288], index: 4, kind: input, shape index: {}]   ;;  %s3205_s3 = inlined_call_operand.vmem [shape: f32[32,32], index: 3, kind: input, shape index: {}]   ;;  %s3206_s2 = inlined_call_operand.vmem [shape: bf16[40,128], index: 2, kind: input, shape index: {}]   ;;  %s3207_s7 = inlined_call_operand.vmem [shape: f32[8,16], index: 7, kind: output, shape index: {1}]   ;;  %s3208_s5 = inlined_call_operand.vmem [shape: f32[8,8], index: 5, kind: input, shape index: {}]   ;;  %s3209_s6 = inlined_call_operand.vmem [shape: f32[8,128], index: 6, kind: output, shape index: {0}]  }
   0x1   :  { %v2621_v0 = vld [vmem:[%s3202_s1 + $0x10] sm:$0xff]   ;;  %v2818_v1 = vld [vmem:[%s3202_s1] sm:$0xff]   ;;  %v2625_v3 = vld [vmem:[%s3203_s0 + $0x18] sm:$0xff]   ;;  %vm174_vm2 = vcmask 261120   ;;  %vm851_vm3 = vcmask 1043456   ;;  %vm847_vm4 = vcmask 64512  }
   0x2   :  { %v2624_v2 = vld [vmem:[%s3203_s0 + $0x10] sm:$0xff]   ;;  %2597 = vmatprep.subr.bf16.mxu1 %v2621_v0  ;;  %2300 = vmatprep.subr.bf16.mxu0 %v2621_v0  ;;  %v2626_v4 = vld [vmem:[%s3203_s0] sm:$0xff]   ;;  %v2627_v6 = vld [vmem:[%s3203_s0 + $0x8] sm:$0xff]   ;;  %s2768_s13 = smov 16   ;;  %s2769_s14 = smov 48   ;;  %vm2125_vm5 = vcmask 392192  }
   0x3   :  { %2598 = vmatpush3.bf16.msra.mxu1 %v2621_v0  ;;  %2306 = vmatprep.mubr.msk.bf16.mxu1 %vm84_vm0, %v2624_v2  ;;  %v2840_v7 = vld [vmem:[%s3202_s1 + $0x8] sm:$0xff]   ;;  %v2144_v9 = vld [vmem:[%s3204_s4] ss:$0 sm:$0xff]  ;;  %s2770_s0 = smov 80   ;;  %s2771_s1 = smov 96   ;;  %vm2127_vm6 = vcmask 523264  }
   0x4   :  { %2301 = vmatpush3.bf16.msra.mxu0 %v2621_v0  ;;  %2310 = vmatprep.subr.bf16.mxu1 %v2760_v5  ;;  %vm2129_vm7 = vcmask 654336   ;;  %vm2131_vm8 = vcmask 785408   ;;  %vm2133_vm9 = vcmask 916480  }
   0x5   :  { %2302 = vmatprep.mubr.msk.bf16.mxu0 %vm84_vm0, %v2626_v4  ;;  %2326 = vmatprep.subr.bf16.mxu0 %v2760_v5 }
   0x6   :  { %2307 = vmatmul.mubr.msk.bf16.vlgmr.msra.gmra.mrb[0].mxu1 %vm84_vm0, %v2625_v3 }
   0x7   :  { %2311 = vmatpush3.bf16.msra.mxu1 %v2818_v1  ;;  %2303 = vmatmul.mubr.msk.bf16.vlgmr.msra.gmra.mrb[0].mxu0 %vm84_vm0, %v2627_v6 }
   0x8   :  { %2312 = vmatprep.subr.bf16.mxu1 %v2760_v5  ;;  %2314 = vmatprep.mubr.msk.bf16.mxu1 %vm2761_vm1, %v2760_v5 }
   0x9   :  { %2327 = vmatpush3.bf16.msra.mxu0 %v2818_v1  ;;  %2330 = vmatprep.mubr.msk.bf16.mxu0 %vm2761_vm1, %v2760_v5 }
   0xa   :  { %2328 = vmatprep.subr.bf16.mxu0 %v2760_v5 }
   0xb   :  { %2313 = vmatpush3.bf16.msra.mxu1 %v2840_v7 }
   0xc   :  { %2318 = vmatprep.subr.bf16.mxu1 %v2760_v5 }
   0xd   :  { %2329 = vmatpush3.bf16.msra.mxu0 %v2840_v7 }
   0xe   :  { %2315 = vmatmul.mubr.bf16.vlgmr.msra.gmra.mrb[4].mxu1 %v2762_v8  ;;  %2342 = vmatprep.subr.bf16.mxu0 %v2760_v5 }
   0xf   :  { %2319 = vmatpush3.bf16.msra.mxu1 %v2818_v1  ;;  %2322 = vmatprep.mubr.msk.bf16.mxu1 %vm2761_vm1, %v2760_v5 }
  0x10   :  { %2320 = vmatprep.subr.bf16.mxu1 %v2760_v5 }
  0x13   :  { %2321 = vmatpush3.bf16.msra.mxu1 %v2840_v7 }
  0x14   :  { %2334 = vmatprep.subr.bf16.mxu1 %v2760_v5 }
  0xd9   :  { %v2308_v10 = vpop.f32.mrb[0].mxu1 }
  0xda   :  { %v2865_v11 = vadd.f32 %v2308_v10, %v2144_v9  ;;  %v147_v12 = vpop.f32.mrb[1].mxu1  ;;  %v2304_v13 = vpop.f32.mrb[0].mxu0 }
  0xdb   :  { %v2867_v14 = vadd.f32 %v2144_v9, %v147_v12  ;;  %v2309_v15 = vpop.f32.mrb[2].mxu1  ;;  %v2869_v16 = vadd.f32 %v2304_v13, %v2144_v9  ;;  %v131_v17 = vpop.f32.mrb[1].mxu0 }
  0xdc   :  { %v2871_v18 = vadd.f32 %v2309_v15, %v2144_v9  ;;  %v150_v19 = vpop.f32.mrb[3].mxu1  ;;  %v2305_v20 = vpop.f32.mrb[2].mxu0  ;;  %v132_v24 = vadd.f32 %v2144_v9, %v131_v17 }
  0xdd   :  { %v2873_v21 = vadd.f32 %v2144_v9, %v150_v19  ;;  %v2875_v22 = vadd.f32 %v2305_v20, %v2144_v9  ;;  %v134_v23 = vpop.f32.mrb[3].mxu0 }
  0xde   :  { %v135_v25 = vadd.f32 %v2144_v9, %v134_v23 }
  0xe1   :  { %v212_v26 = vpop.f32.mrb[4].mxu1 }
  0xe2   :  { %v218_v27 = vadd.f32 %v212_v26, %v132_v24  ;;  %v2316_v28 = vpop.f32.mrb[5].mxu1 }
  0xe3   :  { %v215_v29 = vpop.f32.mrb[6].mxu1 }
  0xe4   :  { %2630 = vtanh.f32 %v218_v27  ;;  %v2317_v30 = vpop.f32.mrb[7].mxu1  ;;  %v2156_v32 = vmul.f32 -1.442695, %v218_v27 }
  0xe6   :  { %2632 = vpow2.f32 %v2156_v32 }
  0xee   :  { %v2631_v31 = vpop.eup %2630 }
  0xef   :  { %228 = vrot.lane.b32.xlu0 %v2631_v31, %s2763_s15 }
  0xf0   :  { %v2633_v33 = vpop.eup %2632 }
  0xf1   :  { %v222_v34 = vadd.f32 1.0, %v2633_v33 }
  0xf3   :  { %2634 = vrcp.f32 %v222_v34 }
  0xfd   :  { %v2635_v35 = vpop.eup %2634 }
  0xfe   :  { %v226_v38 = vmul.f32 0.0, %v2635_v35 }
 0x161   :  { %v229_v36 = vpop.permute.xlu0 %228 }
 0x162   :  { %v231_v37 = vmul.f32 %v2635_v35, %v229_v36 }
 0x164   :  { %233 = vrot.lane.b32.xlu0 %v231_v37, %s2764_s16 }
 0x1d6   :  { %v234_v39 = vpop.permute.xlu0 %233 }
 0x1d7   :  { %v236_v40 = vadd.f32 %v234_v39, %v226_v38 }
 0x1d9   :  { %2636 = vtanh.f32 %v236_v40 }
 0x1e3   :  { %v2637_v41 = vpop.eup %2636 }
 0x1e4   :  { %239 = vrot.lane.b32.xlu1 %v2637_v41, %s2763_s15 }
 0x256   :  { %v240_v42 = vpop.permute.xlu1 %239 }
 0x257   :  { %v242_v43 = vmul.f32 %v2635_v35, %v240_v42 }
 0x259   :  { %v243_v44 = vpack.c.bf16 %v242_v43, %v242_v43 }
 0x25b   :  { %245 = vrot.lane.b32.xlu1 %v243_v44, %s2764_s16 }
 0x2cd   :  { %v246_v45 = vpop.permute.xlu1 %245 }
 0x2ce   :  { %2323 = vmatmul.mubr.msk.bf16.vlgmr.msra.gmra.mrb[8].mxu1 %vm174_vm2, %v246_v45 }
 0x2cf   :  { %2335 = vmatpush3.bf16.msra.mxu1 %v2818_v1  ;;  %2338 = vmatprep.mubr.msk.bf16.mxu1 %vm2761_vm1, %v2760_v5 }
 0x2d0   :  { %2336 = vmatprep.subr.bf16.mxu1 %v2760_v5 }
 0x2d3   :  { %2337 = vmatpush3.bf16.msra.mxu1 %v2840_v7 }
 0x2d4   :  { %2350 = vmatprep.subr.bf16.mxu1 %v2760_v5 }
 0x3a1   :  { %v284_v46 = vpop.f32.mrb[8].mxu1 }
 0x3a2   :  { %v290_v47 = vadd.f32 %v284_v46, %v135_v25  ;;  %v2324_v48 = vpop.f32.mrb[9].mxu1 }
 0x3a3   :  { %v287_v49 = vpop.f32.mrb[10].mxu1 }
 0x3a4   :  { %2638 = vtanh.f32 %v290_v47  ;;  %v2325_v50 = vpop.f32.mrb[11].mxu1  ;;  %v2158_v52 = vmul.f32 -1.442695, %v290_v47 }
 0x3a6   :  { %2640 = vpow2.f32 %v2158_v52 }
 0x3ae   :  { %v2639_v51 = vpop.eup %2638 }
 0x3af   :  { %300 = vrot.lane.b32.xlu0 %v2639_v51, %s2763_s15 }
 0x3b0   :  { %v2641_v53 = vpop.eup %2640 }
 0x3b1   :  { %v294_v54 = vadd.f32 1.0, %v2641_v53 }
 0x3b3   :  { %2642 = vrcp.f32 %v294_v54 }
 0x3bd   :  { %v2643_v55 = vpop.eup %2642 }
 0x3be   :  { %v298_v58 = vmul.f32 %v2643_v55, %v236_v40 }
 0x421   :  { %v301_v56 = vpop.permute.xlu0 %300 }
 0x422   :  { %v303_v57 = vmul.f32 %v2643_v55, %v301_v56 }
 0x424   :  { %305 = vrot.lane.b32.xlu1 %v303_v57, %s2764_s16 }
 0x496   :  { %v306_v59 = vpop.permute.xlu1 %305 }
 0x497   :  { %v308_v60 = vadd.f32 %v306_v59, %v298_v58 }
 0x499   :  { %2644 = vtanh.f32 %v308_v60 }
 0x4a3   :  { %v2645_v61 = vpop.eup %2644 }
 0x4a4   :  { %311 = vrot.lane.b32.xlu0 %v2645_v61, %s2763_s15 }
 0x516   :  { %v312_v62 = vpop.permute.xlu0 %311 }
 0x517   :  { %v314_v63 = vmul.f32 %v2643_v55, %v312_v62 }
 0x519   :  { %v315_v0 = vpack.c.bf16 %v314_v63, %v314_v63 }
 0x51b   :  { %317 = vrot.lane.b32.xlu1 %v315_v0, %s2764_s16 }
 0x58d   :  { %v318_v2 = vpop.permute.xlu1 %317 }
 0x58e   :  { %2331 = vmatmul.mubr.msk.bf16.vlgmr.msra.gmra.mrb[4].mxu0 %vm174_vm2, %v318_v2 }
 0x58f   :  { %2343 = vmatpush3.bf16.msra.mxu0 %v2818_v1  ;;  %2346 = vmatprep.mubr.msk.bf16.mxu0 %vm2761_vm1, %v2760_v5 }
 0x590   :  { %2344 = vmatprep.subr.bf16.mxu0 %v2760_v5 }
 0x593   :  { %2345 = vmatpush3.bf16.msra.mxu0 %v2840_v7 }
 0x594   :  { %2358 = vmatprep.subr.bf16.mxu0 %v2760_v5 }
 0x661   :  { %v356_v3 = vpop.f32.mrb[4].mxu0 }
 0x662   :  { %v362_v4 = vadd.f32 %v356_v3, %v2869_v16  ;;  %v2332_v6 = vpop.f32.mrb[5].mxu0 }
 0x663   :  { %v359_v9 = vpop.f32.mrb[6].mxu0 }
 0x664   :  { %2646 = vtanh.f32 %v362_v4  ;;  %v2333_v10 = vpop.f32.mrb[7].mxu0  ;;  %v2160_v13 = vmul.f32 -1.442695, %v362_v4 }
 0x666   :  { %2648 = vpow2.f32 %v2160_v13 }
 0x66e   :  { %v2647_v12 = vpop.eup %2646 }
 0x66f   :  { %372 = vrot.lane.b32.xlu0 %v2647_v12, %s2763_s15 }
 0x670   :  { %v2649_v15 = vpop.eup %2648 }
 0x671   :  { %v366_v17 = vadd.f32 1.0, %v2649_v15 }
 0x673   :  { %2650 = vrcp.f32 %v366_v17 }
 0x67d   :  { %v2651_v19 = vpop.eup %2650 }
 0x67e   :  { %v370_v24 = vmul.f32 %v2651_v19, %v308_v60 }
 0x6e1   :  { %v373_v20 = vpop.permute.xlu0 %372 }
 0x6e2   :  { %v375_v23 = vmul.f32 %v2651_v19, %v373_v20 }
 0x6e4   :  { %377 = vrot.lane.b32.xlu1 %v375_v23, %s2764_s16 }
 0x756   :  { %v378_v25 = vpop.permute.xlu1 %377 }
 0x757   :  { %v380_v16 = vadd.f32 %v378_v25, %v370_v24 }
 0x759   :  { %2652 = vtanh.f32 %v380_v16 }
 0x763   :  { %v2653_v26 = vpop.eup %2652 }
 0x764   :  { %383 = vrot.lane.b32.xlu0 %v2653_v26, %s2763_s15 }
 0x7d6   :  { %v384_v27 = vpop.permute.xlu0 %383 }
 0x7d7   :  { %v386_v28 = vmul.f32 %v2651_v19, %v384_v27 }
 0x7d9   :  { %v387_v29 = vpack.c.bf16 %v386_v28, %v386_v28 }
 0x7db   :  { %389 = vrot.lane.b32.xlu1 %v387_v29, %s2764_s16 }
 0x84d   :  { %v390_v30 = vpop.permute.xlu1 %389 }
 0x84e   :  { %2339 = vmatmul.mubr.msk.bf16.vlgmr.msra.gmra.mrb[12].mxu1 %vm174_vm2, %v390_v30 }
 0x84f   :  { %2351 = vmatpush3.bf16.msra.mxu1 %v2818_v1  ;;  %2354 = vmatprep.mubr.msk.bf16.mxu1 %vm2761_vm1, %v2760_v5 }
 0x850   :  { %2352 = vmatprep.subr.bf16.mxu1 %v2760_v5 }
 0x853   :  { %2353 = vmatpush3.bf16.msra.mxu1 %v2840_v7 }
 0x854   :  { %2366 = vmatprep.subr.bf16.mxu1 %v2760_v5 }
 0x921   :  { %v428_v31 = vpop.f32.mrb[12].mxu1 }
 0x922   :  { %v434_v32 = vadd.f32 %v428_v31, %v2875_v22  ;;  %v2340_v33 = vpop.f32.mrb[13].mxu1 }
 0x923   :  { %v431_v34 = vpop.f32.mrb[14].mxu1 }
 0x924   :  { %2654 = vtanh.f32 %v434_v32  ;;  %v2341_v35 = vpop.f32.mrb[15].mxu1  ;;  %v2162_v37 = vmul.f32 -1.442695, %v434_v32 }
 0x926   :  { %2656 = vpow2.f32 %v2162_v37 }
 0x92e   :  { %v2655_v36 = vpop.eup %2654 }
 0x92f   :  { %444 = vrot.lane.b32.xlu0 %v2655_v36, %s2763_s15 }
 0x930   :  { %v2657_v38 = vpop.eup %2656 }
 0x931   :  { %v438_v39 = vadd.f32 1.0, %v2657_v38 }
 0x933   :  { %2658 = vrcp.f32 %v438_v39 }
 0x93d   :  { %v2659_v40 = vpop.eup %2658 }
 0x93e   :  { %v442_v43 = vmul.f32 %v2659_v40, %v380_v16 }
 0x9a1   :  { %v445_v41 = vpop.permute.xlu0 %444 }
 0x9a2   :  { %v447_v42 = vmul.f32 %v2659_v40, %v445_v41 }
 0x9a4   :  { %449 = vrot.lane.b32.xlu1 %v447_v42, %s2764_s16 }
 0xa16   :  { %v450_v44 = vpop.permute.xlu1 %449 }
 0xa17   :  { %v452_v22 = vadd.f32 %v450_v44, %v442_v43 }
 0xa19   :  { %2660 = vtanh.f32 %v452_v22 }
 0xa23   :  { %v2661_v45 = vpop.eup %2660 }
 0xa24   :  { %455 = vrot.lane.b32.xlu0 %v2661_v45, %s2763_s15 }
 0xa96   :  { %v456_v46 = vpop.permute.xlu0 %455 }
 0xa97   :  { %v458_v47 = vmul.f32 %v2659_v40, %v456_v46 }
 0xa99   :  { %v459_v48 = vpack.c.bf16 %v458_v47, %v458_v47 }
 0xa9b   :  { %461 = vrot.lane.b32.xlu1 %v459_v48, %s2764_s16 }
 0xb0d   :  { %v462_v49 = vpop.permute.xlu1 %461 }
 0xb0e   :  { %2347 = vmatmul.mubr.msk.bf16.vlgmr.msra.gmra.mrb[8].mxu0 %vm174_vm2, %v462_v49 }
 0xb0f   :  { %2359 = vmatpush3.bf16.msra.mxu0 %v2818_v1  ;;  %2362 = vmatprep.mubr.msk.bf16.mxu0 %vm2761_vm1, %v2760_v5 }
 0xb10   :  { %2360 = vmatprep.subr.bf16.mxu0 %v2760_v5 }
 0xb13   :  { %2361 = vmatpush3.bf16.msra.mxu0 %v2840_v7 }
 0xbe1   :  { %v500_v50 = vpop.f32.mrb[8].mxu0 }
 0xbe2   :  { %v506_v51 = vadd.f32 %v500_v50, %v2867_v14  ;;  %v2348_v52 = vpop.f32.mrb[9].mxu0 }
 0xbe3   :  { %v503_v53 = vpop.f32.mrb[10].mxu0 }
 0xbe4   :  { %2662 = vtanh.f32 %v506_v51  ;;  %v2349_v54 = vpop.f32.mrb[11].mxu0  ;;  %v2164_v56 = vmul.f32 -1.442695, %v506_v51 }
 0xbe6   :  { %2664 = vpow2.f32 %v2164_v56 }
 0xbee   :  { %v2663_v55 = vpop.eup %2662 }
 0xbef   :  { %516 = vrot.lane.b32.xlu0 %v2663_v55, %s2763_s15 }
 0xbf0   :  { %v2665_v57 = vpop.eup %2664 }
 0xbf1   :  { %v510_v58 = vadd.f32 1.0, %v2665_v57 }
 0xbf3   :  { %2666 = vrcp.f32 %v510_v58 }
 0xbfd   :  { %v2667_v59 = vpop.eup %2666 }
 0xbfe   :  { %v514_v62 = vmul.f32 %v2667_v59, %v452_v22 }
 0xc61   :  { %v517_v60 = vpop.permute.xlu0 %516 }
 0xc62   :  { %v519_v61 = vmul.f32 %v2667_v59, %v517_v60 }
 0xc64   :  { %521 = vrot.lane.b32.xlu1 %v519_v61, %s2764_s16 }
 0xcd6   :  { %v522_v63 = vpop.permute.xlu1 %521 }
 0xcd7   :  { %v524_v14 = vadd.f32 %v522_v63, %v514_v62  ;;  %v2765_v63 = vmov 0.0|0.0  }
 0xcd8   :  { %2543 = vmatprep.subr.bf16.mxu0 %v2765_v63 }
 0xcd9   :  { %2668 = vtanh.f32 %v524_v14 }
 0xce3   :  { %v2669_v0 = vpop.eup %2668 }
 0xce4   :  { %527 = vrot.lane.b32.xlu0 %v2669_v0, %s2763_s15  ;;  %v2962_v0 = vld [vmem:[%s3205_s3 + $0x8] sm:$0xff] }
 0xd56   :  { %v528_v2 = vpop.permute.xlu0 %527 }
 0xd57   :  { %v530_v3 = vmul.f32 %v2667_v59, %v528_v2  ;;  %v2967_v2 = vld [vmem:[%s3205_s3 + $0x10] sm:$0xff] }
 0xd59   :  { %v531_v4 = vpack.c.bf16 %v530_v3, %v530_v3 }
 0xd5b   :  { %533 = vrot.lane.b32.xlu1 %v531_v4, %s2764_s16  ;;  %v2974_v4 = vld [vmem:[%s3205_s3 + $0x18] sm:$0xff] }
 0xdcd   :  { %v534_v6 = vpop.permute.xlu1 %533 }
 0xdce   :  { %2355 = vmatmul.mubr.msk.bf16.vlgmr.msra.gmra.mrb[16].mxu1 %vm174_vm2, %v534_v6  ;;  %v2547_v6 = vpack.c.bf16 %v2974_v4, %v2967_v2 }
 0xdcf   :  { %2367 = vmatpush3.bf16.msra.mxu1 %v2818_v1  ;;  %2370 = vmatprep.mubr.msk.bf16.mxu1 %vm2761_vm1, %v2760_v5 }
 0xdd0   :  { %2368 = vmatprep.subr.bf16.mxu1 %v2760_v5 }
 0xdd3   :  { %2369 = vmatpush3.bf16.msra.mxu1 %v2840_v7 }
 0xdd4   :  { %2391 = vmatprep.subr.bf16.mxu1 %v2760_v5 }
 0xea1   :  { %v572_v9 = vpop.f32.mrb[16].mxu1 }
 0xea2   :  { %v578_v10 = vadd.f32 %v572_v9, %v2873_v21  ;;  %v2356_v12 = vpop.f32.mrb[17].mxu1 }
 0xea3   :  { %v575_v13 = vpop.f32.mrb[18].mxu1 }
 0xea4   :  { %2670 = vtanh.f32 %v578_v10  ;;  %v2357_v15 = vpop.f32.mrb[19].mxu1  ;;  %v2166_v1 = vmul.f32 -1.442695, %v578_v10 }
 0xea6   :  { %2672 = vpow2.f32 %v2166_v1  ;;  %v2995_v1 = vld [vmem:[%s3204_s4 + $0x2] ss:$0 sm:$0xff] }
 0xeae   :  { %v2671_v17 = vpop.eup %2670 }
 0xeaf   :  { %588 = vrot.lane.b32.xlu0 %v2671_v17, %s2763_s15  ;;  %v2988_v17 = vld [vmem:[%s3206_s2] sm:$0xff]  }
 0xeb0   :  { %v2673_v19 = vpop.eup %2672 }
 0xeb1   :  { %v582_v20 = vadd.f32 1.0, %v2673_v19 }
 0xeb3   :  { %2674 = vrcp.f32 %v582_v20 }
 0xebd   :  { %v2675_v23 = vpop.eup %2674 }
 0xebe   :  { %v586_v25 = vmul.f32 %v2675_v23, %v524_v14  ;;  %v2957_v14 = vld [vmem:[%s3205_s3] sm:$0xff] }
 0xebf   :  { %v2544_v3 = vpack.c.bf16 %v2962_v0, %v2957_v14 }
 0xf21   :  { %v589_v24 = vpop.permute.xlu0 %588 }
 0xf22   :  { %v591_v7 = vmul.f32 %v2675_v23, %v589_v24 }
 0xf24   :  { %593 = vrot.lane.b32.xlu1 %v591_v7, %s2764_s16 }
 0xf96   :  { %v594_v16 = vpop.permute.xlu1 %593 }
 0xf97   :  { %v596_v21 = vadd.f32 %v594_v16, %v586_v25  ;;  %v3005_v25 = vld [vmem:[%s3206_s2 + $0x8] sm:$0xff]   ;;  %v36_v16 = vld [vmem:[%s3206_s2 + $0x10] sm:$0xf]  ;;  %s2766_s2 = smov 120  }
 0xf99   :  { %2676 = vtanh.f32 %v596_v21 }
 0xfa3   :  { %v2677_v26 = vpop.eup %2676 }
 0xfa4   :  { %599 = vrot.lane.b32.xlu0 %v2677_v26, %s2763_s15 }
0x1016   :  { %v600_v27 = vpop.permute.xlu0 %599 }
0x1017   :  { %v602_v28 = vmul.f32 %v2675_v23, %v600_v27  ;;  %v830_v27 = vld [vmem:[%s3208_s5] sm:$0xff] }
0x1019   :  { %v603_v29 = vpack.c.bf16 %v602_v28, %v602_v28 }
0x101b   :  { %605 = vrot.lane.b32.xlu1 %v603_v29, %s2764_s16 }
0x108d   :  { %v606_v30 = vpop.permute.xlu1 %605 }
0x108e   :  { %2363 = vmatmul.mubr.msk.bf16.vlgmr.msra.gmra.mrb[12].mxu0 %vm174_vm2, %v606_v30 }
0x108f   :  { %2382 = vmatprep.mubr.msk.f32.mxu0 %vm2761_vm1, %v2760_v5  ;;  %2545 = vmatpush3.bf16.msra.mxu0 %v2544_v3 }
0x1090   :  { %2546 = vmatprep.subr.bf16.mxu0 %v2765_v63 }
0x1093   :  { %2548 = vmatpush3.bf16.msra.mxu0 %v2547_v6 }
0x1094   :  { %2385 = vmatprep.subr.bf16.mxu0 %v2760_v5 }
0x1161   :  { %v644_v31 = vpop.f32.mrb[12].mxu0 }
0x1162   :  { %v650_v32 = vadd.f32 %v644_v31, %v2865_v11  ;;  %v2364_v33 = vpop.f32.mrb[13].mxu0 }
0x1163   :  { %v647_v34 = vpop.f32.mrb[14].mxu0 }
0x1164   :  { %2678 = vtanh.f32 %v650_v32  ;;  %v2365_v35 = vpop.f32.mrb[15].mxu0  ;;  %v2168_v37 = vmul.f32 -1.442695, %v650_v32 }
0x1165   :  { %v2173_v35 = vld [vmem:[%s3204_s4 + $0x1] ss:$0 sm:$0xff]  ;;  %s2767_s4 = smov 112  }
0x1166   :  { %2680 = vpow2.f32 %v2168_v37 }
0x116e   :  { %v2679_v36 = vpop.eup %2678 }
0x116f   :  { %660 = vrot.lane.b32.xlu0 %v2679_v36, %s2763_s15 }
0x1170   :  { %v2681_v38 = vpop.eup %2680 }
0x1171   :  { %v654_v39 = vadd.f32 1.0, %v2681_v38 }
0x1173   :  { %2682 = vrcp.f32 %v654_v39 }
0x117d   :  { %v2683_v40 = vpop.eup %2682 }
0x117e   :  { %v658_v43 = vmul.f32 %v2683_v40, %v596_v21  ;;  %v853_v21 = vsel %vm851_vm3, %v36_v16, 0 }
0x11e1   :  { %v661_v41 = vpop.permute.xlu0 %660 }
0x11e2   :  { %v663_v42 = vmul.f32 %v2683_v40, %v661_v41 }
0x11e4   :  { %665 = vrot.lane.b32.xlu1 %v663_v42, %s2764_s16 }
0x1256   :  { %v666_v44 = vpop.permute.xlu1 %665 }
0x1257   :  { %v668_v11 = vadd.f32 %v666_v44, %v658_v43 }
0x1259   :  { %2684 = vtanh.f32 %v668_v11 }
0x1263   :  { %v2685_v22 = vpop.eup %2684 }
0x1264   :  { %671 = vrot.lane.b32.xlu0 %v2685_v22, %s2763_s15 }
0x12d6   :  { %v672_v45 = vpop.permute.xlu0 %671 }
0x12d7   :  { %v674_v46 = vmul.f32 %v2683_v40, %v672_v45 }
0x12d9   :  { %v675_v47 = vpack.c.bf16 %v674_v46, %v674_v46 }
0x12db   :  { %677 = vrot.lane.b32.xlu1 %v675_v47, %s2764_s16 }
0x134d   :  { %v678_v48 = vpop.permute.xlu1 %677 }
0x134e   :  { %2371 = vmatmul.mubr.msk.bf16.vlgmr.msra.gmra.mrb[20].mxu1 %vm174_vm2, %v678_v48 }
0x134f   :  { %2395 = vmatprep.mubr.msk.bf16.mxu1 %vm2761_vm1, %v2760_v5  ;;  %2392 = vmatpush3.bf16.msra.mxu1 %v2988_v17 }
0x1350   :  { %2393 = vmatprep.subr.bf16.mxu1 %v2760_v5 }
0x1353   :  { %2394 = vmatpush3.bf16.msra.mxu1 %v3005_v25 }
0x1354   :  { %2407 = vmatprep.subr.bf16.mxu1 %v2760_v5 }
0x1356   :  { %2396 = vmatmul.mubr.bf16.vlgmr.msra.gmra.mrb[24].mxu1 %v2762_v8 }
0x1357   :  { %2408 = vmatpush3.bf16.msra.mxu1 %v2988_v17  ;;  %2411 = vmatprep.mubr.msk.bf16.mxu1 %vm2761_vm1, %v2760_v5 }
0x1358   :  { %2409 = vmatprep.subr.bf16.mxu1 %v2760_v5 }
0x135b   :  { %2410 = vmatpush3.bf16.msra.mxu1 %v3005_v25 }
0x135c   :  { %2423 = vmatprep.subr.bf16.mxu1 %v2760_v5 }
0x1421   :  { %v716_v49 = vpop.f32.mrb[20].mxu1 }
0x1422   :  { %v722_v50 = vadd.f32 %v716_v49, %v2871_v18  ;;  %v2372_v51 = vpop.f32.mrb[21].mxu1 }
0x1423   :  { %v719_v52 = vpop.f32.mrb[22].mxu1 }
0x1424   :  { %2686 = vtanh.f32 %v722_v50  ;;  %v2373_v53 = vpop.f32.mrb[23].mxu1  ;;  %v2170_v55 = vmul.f32 -1.442695, %v722_v50 }
0x1426   :  { %2688 = vpow2.f32 %v2170_v55 }
0x1429   :  { %v941_v31 = vpop.f32.mrb[24].mxu1 }
0x142a   :  { %v2397_v32 = vpop.f32.mrb[25].mxu1 }
0x142b   :  { %v944_v33 = vpop.f32.mrb[26].mxu1 }
0x142c   :  { %v2398_v34 = vpop.f32.mrb[27].mxu1 }
0x142e   :  { %v2687_v54 = vpop.eup %2686 }
0x142f   :  { %732 = vrot.lane.b32.xlu0 %v2687_v54, %s2763_s15 }
0x1430   :  { %v2689_v56 = vpop.eup %2688 }
0x1431   :  { %v726_v57 = vadd.f32 1.0, %v2689_v56 }
0x1433   :  { %2690 = vrcp.f32 %v726_v57 }
0x143d   :  { %v2691_v58 = vpop.eup %2690 }
0x143e   :  { %v730_v61 = vmul.f32 %v2691_v58, %v668_v11 }
0x14a1   :  { %v733_v59 = vpop.permute.xlu0 %732 }
0x14a2   :  { %v735_v60 = vmul.f32 %v2691_v58, %v733_v59 }
0x14a4   :  { %737 = vrot.lane.b32.xlu1 %v735_v60, %s2764_s16 }
0x1516   :  { %v738_v62 = vpop.permute.xlu1 %737 }
0x1517   :  { %v740_v18 = vadd.f32 %v738_v62, %v730_v61 }
0x1519   :  { %2692 = vtanh.f32 %v740_v18 }
0x1523   :  { %v2693_v9 = vpop.eup %2692 }
0x1524   :  { %743 = vrot.lane.b32.xlu0 %v2693_v9, %s2763_s15 }
0x1596   :  { %v744_v10 = vpop.permute.xlu0 %743 }
0x1597   :  { %v746_v12 = vmul.f32 %v2691_v58, %v744_v10 }
0x1599   :  { %v747_v13 = vmax.f32 %v746_v12, 0.0 }
0x159b   :  { %755 = vrot.lane.b32.xlu1 %v747_v13, %s2764_s16 }
0x160d   :  { %v756_v15 = vpop.permute.xlu1 %755 }
0x160e   :  { %2383 = vmatmul.mubr.msk.f32.vlgmr.msra.gmra.mrb[16].mxu0 %vm174_vm2, %v756_v15 }
0x160f   :  { %2387 = vmatprep.mubr.msk.bf16.mxu0 %vm2761_vm1, %v2760_v5  ;;  %2386 = vmatpush3.bf16.msra.mxu0 %v853_v21 }
0x1610   :  { %2399 = vmatprep.subr.bf16.mxu0 %v2760_v5 }
0x16e1   :  { %v825_v19 = vpop.f32.mrb[16].mxu0 }
0x16e2   :  { %v826_v20 = vadd.f32 %v2995_v1, %v825_v19  ;;  %v2384_v23 = vpop.f32.mrb[17].mxu0 }
0x16e4   :  { %829 = vst.msk [vmem:[%s3207_s7] sm:$0xff] %vm84_vm0, %v826_v20  ;;  %v831_v24 = vmul.f32 0.5, %v826_v20 }
0x16e6   :  { %v832_v7 = vmul.f32 1.442695, %v831_v24 }
0x16e8   :  { %2694 = vpow2.f32 %v832_v7 }
0x16f2   :  { %v2695_v26 = vpop.eup %2694 }
0x16f3   :  { %835 = vrot.lane.b32.xlu0 %v2695_v26, %s2766_s2 }
0x1765   :  { %v836_v28 = vpop.permute.xlu0 %835 }
0x1766   :  { %v838_v8 = vmul.f32 %v836_v28, %v830_v27 }
0x1768   :  { %v839_v29 = vadd.f32 %v838_v8, %v826_v20 }
0x176a   :  { %v840_v30 = vpack.c.bf16 %v839_v29, %v839_v29 }
0x176c   :  { %2388 = vmatmul.mubr.msk.bf16.vlgmr.msra.gmra.mrb[20].mxu0 %vm847_vm4, %v840_v30 }
0x176d   :  { %2400 = vmatpush3.bf16.msra.mxu0 %v2988_v17  ;;  %2403 = vmatprep.mubr.msk.bf16.mxu0 %vm2761_vm1, %v2760_v5 }
0x176e   :  { %2401 = vmatprep.subr.bf16.mxu0 %v2760_v5 }
0x1771   :  { %2402 = vmatpush3.bf16.msra.mxu0 %v3005_v25 }
0x1772   :  { %2415 = vmatprep.subr.bf16.mxu0 %v2760_v5 }
0x183f   :  { %v889_v36 = vpop.f32.mrb[20].mxu0 }
0x1840   :  { %v3032_v37 = vadd.f32 %v2173_v35, %v889_v36  ;;  %v2389_v38 = vpop.f32.mrb[21].mxu0 }
0x1841   :  { %v892_v39 = vpop.f32.mrb[22].mxu0 }
0x1842   :  { %v947_v40 = vadd.f32 %v941_v31, %v3032_v37  ;;  %v2390_v41 = vpop.f32.mrb[23].mxu0 }
0x1844   :  { %2696 = vtanh.f32 %v947_v40  ;;  %v2177_v43 = vmul.f32 -1.442695, %v947_v40 }
0x1846   :  { %2698 = vpow2.f32 %v2177_v43 }
0x184e   :  { %v2697_v42 = vpop.eup %2696 }
0x184f   :  { %957 = vrot.lane.b32.xlu1 %v2697_v42, %s2763_s15 }
0x1850   :  { %v2699_v44 = vpop.eup %2698 }
0x1851   :  { %v951_v11 = vadd.f32 1.0, %v2699_v44 }
0x1853   :  { %2700 = vrcp.f32 %v951_v11 }
0x185d   :  { %v2701_v22 = vpop.eup %2700 }
0x185e   :  { %v955_v47 = vmul.f32 0.0, %v2701_v22 }
0x18c1   :  { %v958_v45 = vpop.permute.xlu1 %957 }
0x18c2   :  { %v960_v46 = vmul.f32 %v2701_v22, %v958_v45 }
0x18c4   :  { %962 = vrot.lane.b32.xlu0 %v960_v46, %s2764_s16 }
0x1936   :  { %v963_v48 = vpop.permute.xlu0 %962 }
0x1937   :  { %v965_v49 = vadd.f32 %v963_v48, %v955_v47 }
0x1939   :  { %2702 = vtanh.f32 %v965_v49 }
0x1943   :  { %v2703_v50 = vpop.eup %2702 }
0x1944   :  { %968 = vrot.lane.b32.xlu1 %v2703_v50, %s2763_s15 }
0x19b6   :  { %v969_v51 = vpop.permute.xlu1 %968 }
0x19b7   :  { %v3038_v52 = vmul.f32 %v2701_v22, %v969_v51 }
0x19b9   :  { %v972_v53 = vpack.c.bf16 %v3038_v52, %v3038_v52 }
0x19bb   :  { %974 = vrot.lane.b32.xlu0 %v972_v53, %s2764_s16 }
0x1a2d   :  { %v975_v54 = vpop.permute.xlu0 %974 }
0x1a2e   :  { %2404 = vmatmul.mubr.msk.bf16.vlgmr.msra.gmra.mrb[24].mxu0 %vm174_vm2, %v975_v54 }
0x1a2f   :  { %2416 = vmatpush3.bf16.msra.mxu0 %v2988_v17  ;;  %2419 = vmatprep.mubr.msk.bf16.mxu0 %vm2761_vm1, %v2760_v5 }
0x1a30   :  { %2417 = vmatprep.subr.bf16.mxu0 %v2760_v5 }
0x1a33   :  { %2418 = vmatpush3.bf16.msra.mxu0 %v3005_v25 }
0x1a34   :  { %2431 = vmatprep.subr.bf16.mxu0 %v2760_v5 }
0x1b01   :  { %v1013_v55 = vpop.f32.mrb[24].mxu0 }
0x1b02   :  { %v1019_v56 = vadd.f32 %v1013_v55, %v3032_v37  ;;  %v2405_v57 = vpop.f32.mrb[25].mxu0 }
0x1b03   :  { %v1016_v58 = vpop.f32.mrb[26].mxu0 }
0x1b04   :  { %2704 = vtanh.f32 %v1019_v56  ;;  %v2406_v59 = vpop.f32.mrb[27].mxu0  ;;  %v2179_v61 = vmul.f32 -1.442695, %v1019_v56 }
0x1b06   :  { %2706 = vpow2.f32 %v2179_v61 }
0x1b0e   :  { %v2705_v60 = vpop.eup %2704 }
0x1b0f   :  { %1029 = vrot.lane.b32.xlu1 %v2705_v60, %s2763_s15 }
0x1b10   :  { %v2707_v62 = vpop.eup %2706 }
0x1b11   :  { %v1023_v18 = vadd.f32 1.0, %v2707_v62 }
0x1b13   :  { %2708 = vrcp.f32 %v1023_v18 }
0x1b1d   :  { %v2709_v3 = vpop.eup %2708 }
0x1b1e   :  { %v1027_v10 = vmul.f32 %v2709_v3, %v965_v49 }
0x1b81   :  { %v1030_v6 = vpop.permute.xlu1 %1029 }
0x1b82   :  { %v1032_v9 = vmul.f32 %v2709_v3, %v1030_v6 }
0x1b84   :  { %1034 = vrot.lane.b32.xlu0 %v1032_v9, %s2764_s16 }
0x1bf6   :  { %v1035_v12 = vpop.permute.xlu0 %1034 }
0x1bf7   :  { %v1037_v13 = vadd.f32 %v1035_v12, %v1027_v10 }
0x1bf9   :  { %2710 = vtanh.f32 %v1037_v13 }
0x1c03   :  { %v2711_v15 = vpop.eup %2710 }
0x1c04   :  { %1040 = vrot.lane.b32.xlu1 %v2711_v15, %s2763_s15 }
0x1c76   :  { %v1041_v19 = vpop.permute.xlu1 %1040 }
0x1c77   :  { %v3054_v20 = vmul.f32 %v2709_v3, %v1041_v19 }
0x1c79   :  { %v1044_v23 = vpack.c.bf16 %v3054_v20, %v3054_v20 }
0x1c7b   :  { %1046 = vrot.lane.b32.xlu0 %v1044_v23, %s2764_s16 }
0x1ced   :  { %v1047_v24 = vpop.permute.xlu0 %1046 }
0x1cee   :  { %2412 = vmatmul.mubr.msk.bf16.vlgmr.msra.gmra.mrb[28].mxu1 %vm174_vm2, %v1047_v24 }
0x1cef   :  { %2424 = vmatpush3.bf16.msra.mxu1 %v2988_v17  ;;  %2427 = vmatprep.mubr.msk.bf16.mxu1 %vm2761_vm1, %v2760_v5 }
0x1cf0   :  { %2425 = vmatprep.subr.bf16.mxu1 %v2760_v5 }
0x1cf3   :  { %2426 = vmatpush3.bf16.msra.mxu1 %v3005_v25 }
0x1cf4   :  { %2439 = vmatprep.subr.bf16.mxu1 %v2760_v5 }
0x1dc1   :  { %v1085_v7 = vpop.f32.mrb[28].mxu1 }
0x1dc2   :  { %v1091_v16 = vadd.f32 %v1085_v7, %v3032_v37  ;;  %v2413_v21 = vpop.f32.mrb[29].mxu1 }
0x1dc3   :  { %v1088_v26 = vpop.f32.mrb[30].mxu1 }
0x1dc4   :  { %2712 = vtanh.f32 %v1091_v16  ;;  %v2414_v27 = vpop.f32.mrb[31].mxu1  ;;  %v2181_v8 = vmul.f32 -1.442695, %v1091_v16 }
0x1dc6   :  { %2714 = vpow2.f32 %v2181_v8 }
0x1dce   :  { %v2713_v28 = vpop.eup %2712 }
0x1dcf   :  { %1101 = vrot.lane.b32.xlu1 %v2713_v28, %s2763_s15 }
0x1dd0   :  { %v2715_v29 = vpop.eup %2714 }
0x1dd1   :  { %v1095_v30 = vadd.f32 1.0, %v2715_v29 }
0x1dd3   :  { %2716 = vrcp.f32 %v1095_v30 }
0x1ddd   :  { %v2717_v31 = vpop.eup %2716 }
0x1dde   :  { %v1099_v34 = vmul.f32 %v2717_v31, %v1037_v13 }
0x1e41   :  { %v1102_v32 = vpop.permute.xlu1 %1101 }
0x1e42   :  { %v1104_v33 = vmul.f32 %v2717_v31, %v1102_v32 }
0x1e44   :  { %1106 = vrot.lane.b32.xlu0 %v1104_v33, %s2764_s16 }
0x1eb6   :  { %v1107_v35 = vpop.permute.xlu0 %1106 }
0x1eb7   :  { %v1109_v36 = vadd.f32 %v1107_v35, %v1099_v34 }
0x1eb9   :  { %2718 = vtanh.f32 %v1109_v36 }
0x1ec3   :  { %v2719_v38 = vpop.eup %2718 }
0x1ec4   :  { %1112 = vrot.lane.b32.xlu1 %v2719_v38, %s2763_s15 }
0x1f36   :  { %v1113_v39 = vpop.permute.xlu1 %1112 }
0x1f37   :  { %v3070_v40 = vmul.f32 %v2717_v31, %v1113_v39 }
0x1f39   :  { %v1116_v41 = vpack.c.bf16 %v3070_v40, %v3070_v40 }
0x1f3b   :  { %1118 = vrot.lane.b32.xlu0 %v1116_v41, %s2764_s16 }
0x1fad   :  { %v1119_v42 = vpop.permute.xlu0 %1118 }
0x1fae   :  { %2420 = vmatmul.mubr.msk.bf16.vlgmr.msra.gmra.mrb[28].mxu0 %vm174_vm2, %v1119_v42 }
0x1faf   :  { %2432 = vmatpush3.bf16.msra.mxu0 %v2988_v17  ;;  %2435 = vmatprep.mubr.msk.bf16.mxu0 %vm2761_vm1, %v2760_v5 }
0x1fb0   :  { %2433 = vmatprep.subr.bf16.mxu0 %v2760_v5 }
0x1fb3   :  { %2434 = vmatpush3.bf16.msra.mxu0 %v3005_v25 }
0x1fb4   :  { %2447 = vmatprep.subr.bf16.mxu0 %v2760_v5 }
0x2081   :  { %v1157_v43 = vpop.f32.mrb[28].mxu0 }
0x2082   :  { %v1163_v44 = vadd.f32 %v1157_v43, %v3032_v37  ;;  %v2421_v11 = vpop.f32.mrb[29].mxu0 }
0x2083   :  { %v1160_v22 = vpop.f32.mrb[30].mxu0 }
0x2084   :  { %2720 = vtanh.f32 %v1163_v44  ;;  %v2422_v45 = vpop.f32.mrb[31].mxu0  ;;  %v2183_v47 = vmul.f32 -1.442695, %v1163_v44 }
0x2086   :  { %2722 = vpow2.f32 %v2183_v47 }
0x208e   :  { %v2721_v46 = vpop.eup %2720 }
0x208f   :  { %1173 = vrot.lane.b32.xlu1 %v2721_v46, %s2763_s15 }
0x2090   :  { %v2723_v48 = vpop.eup %2722 }
0x2091   :  { %v1167_v49 = vadd.f32 1.0, %v2723_v48 }
0x2093   :  { %2724 = vrcp.f32 %v1167_v49 }
0x209d   :  { %v2725_v50 = vpop.eup %2724 }
0x209e   :  { %v1171_v54 = vmul.f32 %v2725_v50, %v1109_v36 }
0x2101   :  { %v1174_v51 = vpop.permute.xlu1 %1173 }
0x2102   :  { %v1176_v53 = vmul.f32 %v2725_v50, %v1174_v51 }
0x2104   :  { %1178 = vrot.lane.b32.xlu0 %v1176_v53, %s2764_s16 }
0x2176   :  { %v1179_v55 = vpop.permute.xlu0 %1178 }
0x2177   :  { %v1181_v56 = vadd.f32 %v1179_v55, %v1171_v54 }
0x2179   :  { %2726 = vtanh.f32 %v1181_v56 }
0x2183   :  { %v2727_v57 = vpop.eup %2726 }
0x2184   :  { %1184 = vrot.lane.b32.xlu1 %v2727_v57, %s2763_s15 }
0x21f6   :  { %v1185_v58 = vpop.permute.xlu1 %1184 }
0x21f7   :  { %v3086_v59 = vmul.f32 %v2725_v50, %v1185_v58 }
0x21f9   :  { %v1188_v60 = vpack.c.bf16 %v3086_v59, %v3086_v59 }
0x21fb   :  { %1190 = vrot.lane.b32.xlu0 %v1188_v60, %s2764_s16 }
0x226d   :  { %v1191_v61 = vpop.permute.xlu0 %1190 }
0x226e   :  { %2428 = vmatmul.mubr.msk.bf16.vlgmr.msra.gmra.mrb[32].mxu1 %vm174_vm2, %v1191_v61 }
0x226f   :  { %2440 = vmatpush3.bf16.msra.mxu1 %v2988_v17  ;;  %2443 = vmatprep.mubr.msk.bf16.mxu1 %vm2761_vm1, %v2760_v5 }
0x2270   :  { %2441 = vmatprep.subr.bf16.mxu1 %v2760_v5 }
0x2273   :  { %2442 = vmatpush3.bf16.msra.mxu1 %v3005_v25 }
0x2274   :  { %2549 = vmatprep.subr.bf16.mxu1 %v2765_v63 }
0x2341   :  { %v1229_v62 = vpop.f32.mrb[32].mxu1 }
0x2342   :  { %v1235_v18 = vadd.f32 %v1229_v62, %v3032_v37  ;;  %v2429_v3 = vpop.f32.mrb[33].mxu1 }
0x2343   :  { %v1232_v6 = vpop.f32.mrb[34].mxu1 }
0x2344   :  { %2728 = vtanh.f32 %v1235_v18  ;;  %v2430_v9 = vpop.f32.mrb[35].mxu1  ;;  %v2185_v12 = vmul.f32 -1.442695, %v1235_v18 }
0x2346   :  { %2730 = vpow2.f32 %v2185_v12 }
0x234e   :  { %v2729_v10 = vpop.eup %2728 }
0x234f   :  { %1245 = vrot.lane.b32.xlu1 %v2729_v10, %s2763_s15 }
0x2350   :  { %v2731_v13 = vpop.eup %2730 }
0x2351   :  { %v1239_v15 = vadd.f32 1.0, %v2731_v13 }
0x2353   :  { %2732 = vrcp.f32 %v1239_v15 }
0x235d   :  { %v2733_v19 = vpop.eup %2732 }
0x235e   :  { %v1243_v7 = vmul.f32 %v2733_v19, %v1181_v56 }
0x23c1   :  { %v1246_v23 = vpop.permute.xlu1 %1245 }
0x23c2   :  { %v1248_v24 = vmul.f32 %v2733_v19, %v1246_v23 }
0x23c4   :  { %1250 = vrot.lane.b32.xlu0 %v1248_v24, %s2764_s16 }
0x2436   :  { %v1251_v16 = vpop.permute.xlu0 %1250 }
0x2437   :  { %v1253_v21 = vadd.f32 %v1251_v16, %v1243_v7 }
0x2439   :  { %2734 = vtanh.f32 %v1253_v21 }
0x2443   :  { %v2735_v26 = vpop.eup %2734 }
0x2444   :  { %1256 = vrot.lane.b32.xlu1 %v2735_v26, %s2763_s15 }
0x24b6   :  { %v1257_v27 = vpop.permute.xlu1 %1256 }
0x24b7   :  { %v3102_v28 = vmul.f32 %v2733_v19, %v1257_v27 }
0x24b9   :  { %v1260_v8 = vpack.c.bf16 %v3102_v28, %v3102_v28 }
0x24bb   :  { %1262 = vrot.lane.b32.xlu0 %v1260_v8, %s2764_s16 }
0x252d   :  { %v1263_v29 = vpop.permute.xlu0 %1262 }
0x252e   :  { %2436 = vmatmul.mubr.msk.bf16.vlgmr.msra.gmra.mrb[32].mxu0 %vm174_vm2, %v1263_v29 }
0x252f   :  { %2448 = vmatpush3.bf16.msra.mxu0 %v2988_v17  ;;  %2451 = vmatprep.mubr.msk.bf16.mxu0 %vm2761_vm1, %v2760_v5 }
0x2530   :  { %2449 = vmatprep.subr.bf16.mxu0 %v2760_v5 }
0x2533   :  { %2450 = vmatpush3.bf16.msra.mxu0 %v3005_v25 }
0x2534   :  { %2555 = vmatprep.subr.bf16.mxu0 %v2765_v63 }
0x2601   :  { %v1301_v30 = vpop.f32.mrb[32].mxu0 }
0x2602   :  { %v1307_v31 = vadd.f32 %v1301_v30, %v3032_v37  ;;  %v2437_v32 = vpop.f32.mrb[33].mxu0 }
0x2603   :  { %v1304_v33 = vpop.f32.mrb[34].mxu0 }
0x2604   :  { %2736 = vtanh.f32 %v1307_v31  ;;  %v2438_v34 = vpop.f32.mrb[35].mxu0  ;;  %v2187_v17 = vmul.f32 -1.442695, %v1307_v31 }
0x2606   :  { %2738 = vpow2.f32 %v2187_v17 }
0x260e   :  { %v2737_v35 = vpop.eup %2736 }
0x260f   :  { %1317 = vrot.lane.b32.xlu1 %v2737_v35, %s2763_s15 }
0x2610   :  { %v2739_v36 = vpop.eup %2738 }
0x2611   :  { %v1311_v38 = vadd.f32 1.0, %v2739_v36 }
0x2613   :  { %2740 = vrcp.f32 %v1311_v38 }
0x261d   :  { %v2741_v39 = vpop.eup %2740 }
0x261e   :  { %v1315_v42 = vmul.f32 %v2741_v39, %v1253_v21 }
0x2681   :  { %v1318_v41 = vpop.permute.xlu1 %1317 }
0x2682   :  { %v1320_v25 = vmul.f32 %v2741_v39, %v1318_v41 }
0x2684   :  { %1322 = vrot.lane.b32.xlu0 %v1320_v25, %s2764_s16 }
0x26f6   :  { %v1323_v43 = vpop.permute.xlu0 %1322 }
0x26f7   :  { %v1325_v44 = vadd.f32 %v1323_v43, %v1315_v42 }
0x26f9   :  { %2742 = vtanh.f32 %v1325_v44 }
0x2703   :  { %v2743_v11 = vpop.eup %2742 }
0x2704   :  { %1328 = vrot.lane.b32.xlu1 %v2743_v11, %s2763_s15 }
0x2776   :  { %v1329_v22 = vpop.permute.xlu1 %1328 }
0x2777   :  { %v3118_v45 = vmul.f32 %v2741_v39, %v1329_v22 }
0x2779   :  { %v1332_v46 = vpack.c.bf16 %v3118_v45, %v3118_v45 }
0x277b   :  { %1334 = vrot.lane.b32.xlu0 %v1332_v46, %s2764_s16 }
0x27ed   :  { %v1335_v47 = vpop.permute.xlu0 %1334 }
0x27ee   :  { %2444 = vmatmul.mubr.msk.bf16.vlgmr.msra.gmra.mrb[36].mxu1 %vm174_vm2, %v1335_v47 }
0x27ef   :  { %2463 = vmatprep.mubr.msk.f32.mxu1 %vm2761_vm1, %v2760_v5 }
0x28c1   :  { %v1373_v48 = vpop.f32.mrb[36].mxu1 }
0x28c2   :  { %v1379_v49 = vadd.f32 %v1373_v48, %v3032_v37  ;;  %v2445_v50 = vpop.f32.mrb[37].mxu1 }
0x28c3   :  { %v1376_v51 = vpop.f32.mrb[38].mxu1 }
0x28c4   :  { %2744 = vtanh.f32 %v1379_v49  ;;  %v2446_v53 = vpop.f32.mrb[39].mxu1  ;;  %v2189_v55 = vmul.f32 -1.442695, %v1379_v49 }
0x28c6   :  { %2746 = vpow2.f32 %v2189_v55 }
0x28ce   :  { %v2745_v54 = vpop.eup %2744 }
0x28cf   :  { %1389 = vrot.lane.b32.xlu1 %v2745_v54, %s2763_s15 }
0x28d0   :  { %v2747_v56 = vpop.eup %2746 }
0x28d1   :  { %v1383_v57 = vadd.f32 1.0, %v2747_v56 }
0x28d3   :  { %2748 = vrcp.f32 %v1383_v57 }
0x28dd   :  { %v2749_v58 = vpop.eup %2748 }
0x28de   :  { %v1387_v62 = vmul.f32 %v2749_v58, %v1325_v44 }
0x2941   :  { %v1390_v60 = vpop.permute.xlu1 %1389 }
0x2942   :  { %v1392_v61 = vmul.f32 %v2749_v58, %v1390_v60 }
0x2944   :  { %1394 = vrot.lane.b32.xlu0 %v1392_v61, %s2764_s16 }
0x29b6   :  { %v1395_v18 = vpop.permute.xlu0 %1394 }
0x29b7   :  { %v1397_v3 = vadd.f32 %v1395_v18, %v1387_v62 }
0x29b9   :  { %2750 = vtanh.f32 %v1397_v3 }
0x29c3   :  { %v2751_v6 = vpop.eup %2750 }
0x29c4   :  { %1400 = vrot.lane.b32.xlu1 %v2751_v6, %s2763_s15 }
0x2a36   :  { %v1401_v9 = vpop.permute.xlu1 %1400 }
0x2a37   :  { %v1403_v10 = vmul.f32 %v2749_v58, %v1401_v9 }
0x2a39   :  { %v1404_v12 = vpack.c.bf16 %v1403_v10, %v1403_v10 }
0x2a3b   :  { %1406 = vrot.lane.b32.xlu0 %v1404_v12, %s2764_s16 }
0x2aad   :  { %v1407_v13 = vpop.permute.xlu0 %1406 }
0x2aae   :  { %2452 = vmatmul.mubr.msk.bf16.vlgmr.msra.gmra.mrb[36].mxu0 %vm174_vm2, %v1407_v13 }
0x2aaf   :  { %2474 = vmatprep.mubr.msk.f32.mxu0 %vm2761_vm1, %v2760_v5 }
0x2b81   :  { %v1445_v15 = vpop.f32.mrb[36].mxu0 }
0x2b82   :  { %v1451_v19 = vadd.f32 %v1445_v15, %v3032_v37  ;;  %v2453_v23 = vpop.f32.mrb[37].mxu0  ;;  %v2611_v37 = vpack.i.bf16 %v2962_v0, %v2957_v14 }
0x2b83   :  { %v1448_v24 = vpop.f32.mrb[38].mxu0 }
0x2b84   :  { %2752 = vtanh.f32 %v1451_v19  ;;  %v2454_v7 = vpop.f32.mrb[39].mxu0  ;;  %v2191_v21 = vmul.f32 -1.442695, %v1451_v19 }
0x2b86   :  { %2754 = vpow2.f32 %v2191_v21 }
0x2b8e   :  { %v2753_v16 = vpop.eup %2752 }
0x2b8f   :  { %1461 = vrot.lane.b32.xlu1 %v2753_v16, %s2763_s15 }
0x2b90   :  { %v2755_v26 = vpop.eup %2754 }
0x2b91   :  { %v1455_v27 = vadd.f32 1.0, %v2755_v26 }
0x2b93   :  { %2756 = vrcp.f32 %v1455_v27 }
0x2b9d   :  { %v2757_v8 = vpop.eup %2756 }
0x2b9e   :  { %v1459_v31 = vmul.f32 %v2757_v8, %v1397_v3 }
0x2c01   :  { %v1462_v29 = vpop.permute.xlu1 %1461 }
0x2c02   :  { %v1464_v30 = vmul.f32 %v2757_v8, %v1462_v29 }
0x2c04   :  { %1466 = vrot.lane.b32.xlu0 %v1464_v30, %s2764_s16 }
0x2c08   :  { %2612 = vrot.lane.b32.xlu0 %v2611_v37, %s2767_s4 }
0x2c0c   :  { %1477 = vrot.lane.b32.xlu0 %v3038_v52, %s2764_s16 }
0x2c10   :  { %1646 = vrot.lane.b32.xlu0 %v3070_v40, %s2764_s16 }
0x2c14   :  { %1796 = vrot.lane.b32.xlu0 %v3102_v28, %s2764_s16 }
0x2c18   :  { %1946 = vrot.lane.b32.xlu0 %v1403_v10, %s2764_s16 }
0x2c1c   :  { %1495 = vrot.lane.b32.xlu0 %v2995_v1, %s2767_s4  ;;  %v2616_v1 = vpack.i.bf16 %v2974_v4, %v2967_v2 }
0x2c76   :  { %v1467_v32 = vpop.permute.xlu0 %1466 }
0x2c77   :  { %v1469_v14 = vadd.f32 %v1467_v32, %v1459_v31 }
0x2c79   :  { %2758 = vtanh.f32 %v1469_v14 }
0x2c7a   :  { %v2613_v0 = vpop.permute.xlu0 %2612 }
0x2c7b   :  { %v2615_v33 = vunpack.i.h.bf16 %v2613_v0  ;;  %v2614_v34 = vunpack.i.l.bf16 %v2613_v0 }
0x2c7d   :  { %v2550_v35 = vpack.c.bf16 %v2615_v33, %v2614_v34 }
0x2c7e   :  { %v1478_v2 = vpop.permute.xlu0 %1477 }
0x2c7f   :  { %2551 = vmatpush3.bf16.msra.mxu1 %v2550_v35  ;;  %2557 = vmatpush3.bf16.msra.mxu0 %v2550_v35 }
0x2c80   :  { %2552 = vmatprep.subr.bf16.mxu1 %v2765_v63  ;;  %2558 = vmatprep.subr.bf16.mxu0 %v2765_v63 }
0x2c83   :  { %v2759_v52 = vpop.eup %2758 }
0x2c84   :  { %1472 = vrot.lane.b32.xlu1 %v2759_v52, %s2763_s15 }
0x2c88   :  { %2617 = vrot.lane.b32.xlu1 %v2616_v1, %s2767_s4 }
0x2c8c   :  { %1571 = vrot.lane.b32.xlu1 %v3054_v20, %s2764_s16  ;;  %v1647_v20 = vpop.permute.xlu0 %1646 }
0x2c90   :  { %1721 = vrot.lane.b32.xlu1 %v3086_v59, %s2764_s16  ;;  %v1797_v41 = vpop.permute.xlu0 %1796 }
0x2c94   :  { %1871 = vrot.lane.b32.xlu1 %v3118_v45, %s2764_s16  ;;  %v1947_v42 = vpop.permute.xlu0 %1946 }
0x2c98   :  { %v1496_v44 = vpop.permute.xlu0 %1495 }
0x2cf6   :  { %v1473_v40 = vpop.permute.xlu1 %1472 }
0x2cf7   :  { %v1475_v28 = vmul.f32 %v2757_v8, %v1473_v40 }
0x2cf9   :  { %2021 = vrot.lane.b32.xlu1 %v1475_v28, %s2764_s16 }
0x2cfa   :  { %v2618_v17 = vpop.permute.xlu1 %2617 }
0x2cfb   :  { %v2620_v36 = vunpack.i.h.bf16 %v2618_v17  ;;  %v2619_v38 = vunpack.i.l.bf16 %v2618_v17 }
0x2cfd   :  { %v2553_v39 = vpack.c.bf16 %v2620_v36, %v2619_v38 }
0x2cfe   :  { %v1572_v4 = vpop.permute.xlu1 %1571 }
0x2cff   :  { %2554 = vmatpush3.bf16.msra.mxu1 %v2553_v39  ;;  %2560 = vmatpush3.bf16.msra.mxu0 %v2553_v39 }
0x2d00   :  { %2561 = vmatprep.subr.bf16.mxu1 %v2765_v63  ;;  %2567 = vmatprep.subr.bf16.mxu0 %v2765_v63 }
0x2d02   :  { %2464 = vmatmul.mubr.msk.f32.vlgmr.msra.gmra.mrb[40].mxu1 %vm174_vm2, %v1478_v2  ;;  %2475 = vmatmul.mubr.msk.f32.vlgmr.msra.gmra.mrb[18].mxu0 %vm174_vm2, %v1572_v4  ;;  %v1722_v59 = vpop.permute.xlu1 %1721 }
0x2d03   :  { %2563 = vmatpush3.bf16.msra.mxu1 %v2550_v35  ;;  %2569 = vmatpush3.bf16.msra.mxu0 %v2550_v35 }
0x2d04   :  { %2564 = vmatprep.subr.bf16.mxu1 %v2765_v63  ;;  %2570 = vmatprep.subr.bf16.mxu0 %v2765_v63 }
0x2d05   :  { %2485 = vmatprep.mubr.msk.f32.mxu1 %vm2761_vm1, %v2760_v5  ;;  %2496 = vmatprep.mubr.msk.f32.mxu0 %vm2761_vm1, %v2760_v5 }
0x2d06   :  { %v1872_v25 = vpop.permute.xlu1 %1871 }
0x2d07   :  { %2566 = vmatpush3.bf16.msra.mxu1 %v2553_v39  ;;  %2572 = vmatpush3.bf16.msra.mxu0 %v2553_v39 }
0x2d08   :  { %2573 = vmatprep.subr.bf16.mxu1 %v2765_v63  ;;  %2579 = vmatprep.subr.bf16.mxu0 %v2765_v63 }
0x2d0a   :  { %2486 = vmatmul.mubr.msk.f32.vlgmr.msra.gmra.mrb[42].mxu1 %vm174_vm2, %v1647_v20  ;;  %2497 = vmatmul.mubr.msk.f32.vlgmr.msra.gmra.mrb[40].mxu0 %vm174_vm2, %v1722_v59 }
0x2d0b   :  { %2575 = vmatpush3.bf16.msra.mxu1 %v2550_v35  ;;  %2581 = vmatpush3.bf16.msra.mxu0 %v2550_v35 }
0x2d0c   :  { %2576 = vmatprep.subr.bf16.mxu1 %v2765_v63  ;;  %2582 = vmatprep.subr.bf16.mxu0 %v2765_v63 }
0x2d0d   :  { %2507 = vmatprep.mubr.msk.f32.mxu1 %vm2761_vm1, %v2760_v5  ;;  %2518 = vmatprep.mubr.msk.f32.mxu0 %vm2761_vm1, %v2760_v5 }
0x2d0f   :  { %2578 = vmatpush3.bf16.msra.mxu1 %v2553_v39  ;;  %2584 = vmatpush3.bf16.msra.mxu0 %v2553_v39 }
0x2d10   :  { %2585 = vmatprep.subr.bf16.mxu1 %v2765_v63  ;;  %2591 = vmatprep.subr.bf16.mxu0 %v2765_v63 }
0x2d12   :  { %2508 = vmatmul.mubr.msk.f32.vlgmr.msra.gmra.mrb[44].mxu1 %vm174_vm2, %v1797_v41  ;;  %2519 = vmatmul.mubr.msk.f32.vlgmr.msra.gmra.mrb[42].mxu0 %vm174_vm2, %v1872_v25 }
0x2d13   :  { %2587 = vmatpush3.bf16.msra.mxu1 %v2550_v35  ;;  %2529 = vmatprep.mubr.msk.f32.mxu1 %vm2761_vm1, %v2760_v5 }
0x2d14   :  { %2588 = vmatprep.subr.bf16.mxu1 %v2765_v63  ;;  %2593 = vmatpush3.bf16.msra.mxu0 %v2550_v35 }
0x2d15   :  { %2594 = vmatprep.subr.bf16.mxu0 %v2765_v63  ;;  %2540 = vmatprep.mubr.msk.f32.mxu0 %vm2761_vm1, %v2760_v5 }
0x2d17   :  { %2590 = vmatpush3.bf16.msra.mxu1 %v2553_v39 }
0x2d18   :  { %2596 = vmatpush3.bf16.msra.mxu0 %v2553_v39 }
0x2d1a   :  { %2530 = vmatmul.mubr.msk.f32.vlgmr.msra.gmra.mrb[46].mxu1 %vm174_vm2, %v1947_v42 }
0x2d6b   :  { %v2022_v43 = vpop.permute.xlu1 %2021 }
0x2d6c   :  { %2541 = vmatmul.mubr.msk.f32.vlgmr.msra.gmra.mrb[44].mxu0 %vm174_vm2, %v2022_v43 }
0x2dd5   :  { %v1566_v11 = vpop.f32.mrb[40].mxu1  ;;  %v1641_v22 = vpop.f32.mrb[18].mxu0 }
0x2dd6   :  { %v1642_v45 = vadd.f32 %v1641_v22, %v1496_v44  ;;  %v2465_v46 = vpop.f32.mrb[41].mxu1  ;;  %v2476_v47 = vpop.f32.mrb[19].mxu0  ;;  %v1567_v10 = vadd.f32 %v1566_v11, %v1496_v44 }
0x2dd8   :  { %2096 = vrot.lane.b32.xlu1 %v1642_v45, %s2768_s13 }
0x2ddd   :  { %v1716_v63 = vpop.f32.mrb[42].mxu1  ;;  %v1791_v48 = vpop.f32.mrb[40].mxu0 }
0x2dde   :  { %v1717_v49 = vadd.f32 %v1716_v63, %v1496_v44  ;;  %v1792_v5 = vadd.f32 %v1791_v48, %v1496_v44  ;;  %v2487_v50 = vpop.f32.mrb[43].mxu1  ;;  %v2498_v51 = vpop.f32.mrb[41].mxu0 }
0x2de0   :  { %2104 = vrot.lane.b32.xlu1 %v1792_v5, %s2769_s14  ;;  %2100 = vrot.lane.b32.xlu0 %v1717_v49, %s2764_s16 }
0x2de5   :  { %v1866_v53 = vpop.f32.mrb[44].mxu1  ;;  %v1941_v54 = vpop.f32.mrb[42].mxu0 }
0x2de6   :  { %v1867_v55 = vadd.f32 %v1866_v53, %v1496_v44  ;;  %v1942_v56 = vadd.f32 %v1941_v54, %v1496_v44  ;;  %v2509_v57 = vpop.f32.mrb[45].mxu1  ;;  %v2520_v58 = vpop.f32.mrb[43].mxu0 }
0x2de8   :  { %2112 = vrot.lane.b32.xlu1 %v1942_v56, %s2770_s0  ;;  %2108 = vrot.lane.b32.xlu0 %v1867_v55, %s2763_s15 }
0x2ded   :  { %v2016_v60 = vpop.f32.mrb[46].mxu1 }
0x2dee   :  { %v2017_v61 = vadd.f32 %v2016_v60, %v1496_v44  ;;  %v2531_v62 = vpop.f32.mrb[47].mxu1 }
0x2df0   :  { %2116 = vrot.lane.b32.xlu0 %v2017_v61, %s2771_s1 }
0x2e3f   :  { %v2091_v18 = vpop.f32.mrb[44].mxu0 }
0x2e40   :  { %v2092_v3 = vadd.f32 %v2091_v18, %v1496_v44  ;;  %v2542_v6 = vpop.f32.mrb[45].mxu0 }
0x2e42   :  { %2120 = vrot.lane.b32.xlu1 %v2092_v3, %s2767_s4 }
0x2e4a   :  { %v2097_v9 = vpop.permute.xlu1 %2096 }
0x2e4b   :  { %v2123_v13 = vsel %vm84_vm0, %v1567_v10, %v2097_v9 }
0x2e52   :  { %v2101_v12 = vpop.permute.xlu0 %2100  ;;  %v2105_v15 = vpop.permute.xlu1 %2104 }
0x2e53   :  { %v2124_v19 = vsel %vm174_vm2, %v2123_v13, %v2101_v12 }
0x2e54   :  { %v2126_v24 = vsel %vm2125_vm5, %v2124_v19, %v2105_v15 }
0x2e5a   :  { %v2109_v23 = vpop.permute.xlu0 %2108  ;;  %v2113_v7 = vpop.permute.xlu1 %2112 }
0x2e5b   :  { %v2128_v16 = vsel %vm2127_vm6, %v2126_v24, %v2109_v23 }
0x2e5c   :  { %v2130_v26 = vsel %vm2129_vm7, %v2128_v16, %v2113_v7 }
0x2e62   :  { %v2117_v21 = vpop.permute.xlu0 %2116 }
0x2e63   :  { %v2132_v27 = vsel %vm2131_vm8, %v2130_v26, %v2117_v21 }
0x2eb4   :  { %v2121_v8 = vpop.permute.xlu1 %2120 }
0x2eb5   :  { %v2134_v29 = vsel %vm2133_vm9, %v2132_v27, %v2121_v8 }
0x2eb6   :  { %2135 = vst [vmem:[%s3209_s6] sm:$0xff] %v2134_v29 }

</bundles_post_ra>
